<compile_context>
chip_gen: v5e
topology: v5e:2x2
jax: 0.10.0
libtpu: 0.0.40
codegen_flags: <defaults>
</compile_context>

<pallas_src>
import functools

import jax
import jax.numpy as jnp
from jax.experimental import pallas as pl
from jax.experimental.pallas import tpu as pltpu

DAY_FREQ = 2.0 * jnp.pi / 24.0


def _round_up(x: int, m: int) -> int:
    return ((x + m - 1) // m) * m


def _make_kernel(n_layers: int, n_predictions: int, n_states: int, compute_dtype):
    """Builds the Pallas kernel body (all sizes static; feature-major layout)."""

    def kernel(*refs):
        # refs = (s0_T, cos_T, sin_T, w0s_T, w0c, w0si, b0,
        #         [w1_T, b1, ..., w(L-1)_T, b(L-1)], out)
        s_ref, cos_ref, sin_ref, w0s_ref, w0c_ref, w0si_ref, b0_ref = refs[:7]
        wb_refs = refs[7:7 + 2 * (n_layers - 1)]
        out_ref = refs[7 + 2 * (n_layers - 1)]

        # Hoist all parameter loads out of the prediction loop.
        w0s = w0s_ref[...]                                  # [d_hidden, n_features] cd
        w0c = w0c_ref[...].astype(jnp.float32)              # [d_hidden, 1]
        w0si = w0si_ref[...].astype(jnp.float32)            # [d_hidden, 1]
        b0 = b0_ref[...]                                     # [d_hidden, 1] f32
        ws = [wb_refs[2 * l][...] for l in range(n_layers - 1)]       # cd
        bs = [wb_refs[2 * l + 1][...] for l in range(n_layers - 1)]   # f32

        s = s_ref[...]                                       # [n_features, b_tile] cd
        for idx in range(n_predictions):                     # small static unroll
            # First-layer trig contribution: two broadcast FMAs (VPU), f32.
            c = cos_ref[idx:idx + 1, :].astype(jnp.float32)  # [1, b_tile]
            si = sin_ref[idx:idx + 1, :].astype(jnp.float32)
            trig = w0c * c + w0si * si + b0                  # [d_hidden, b_tile] f32

            # First layer: state part on the MXU (cd x cd -> f32 accumulate).
            h = jnp.maximum(
                jnp.dot(w0s, s, preferred_element_type=jnp.float32) + trig, 0.0)

            for l in range(n_layers - 1):                    # remaining layers
                h = jnp.maximum(
                    jnp.dot(ws[l], h.astype(compute_dtype),
                            preferred_element_type=jnp.float32) + bs[l], 0.0)

            # Lane-dense per-step store of this prediction's states.
            out_ref[idx * n_states:(idx + 1) * n_states, :] = h[:n_states, :]

            # Next-step state is the full output (last layer width == n_features).
            s = h.astype(compute_dtype)

    return kernel


def _pick_batch_tile(B: int, b_tile):
    """Lane-axis batch tiling: multiple of 128, capped, >=2 grid steps on v7x."""
    B128 = _round_up(B, 128)
    if b_tile is None:
        b_tile = min(1024, B128)
        # v7x has 2 TensorCores: prefer >= 2 grid steps when the batch allows it.
        if B128 // b_tile < 2 and B128 >= 256:
            b_tile = _round_up(B128 // 2, 128)
    B_pad = _round_up(B128, b_tile)
    return b_tile, B_pad


def weather_predictor_forward(inputs, weights, biases,
                              n_states, n_prior_states, n_predictions,
                              compute_dtype=jnp.bfloat16, b_tile=None):
    """Wrapper: feature unpacking / trig / transposes in JAX, loop in Pallas."""
    inputs = inputs.astype(jnp.float32)
    B = inputs.shape[0]
    n_features = n_states * (1 + n_prior_states)
    n_layers = len(weights)

    # Static shape checks (the recurrence feeds the last layer's output back in).
    assert weights[0].shape[0] == 2 + n_features, "first layer in_features mismatch"
    assert weights[-1].shape[1] == n_features, \
        "last layer out_features must equal n_features for the recurrence"

    # unpack_discrete_inputs (glue): state part; trig handled via cos/sin streams.
    t0 = inputs[:, 0, 0]                                          # [B]
    flat_state = inputs[:, 1:, :].reshape(B, n_features)          # [B, n_features]

    # cos/sin for every prediction step k (time t0 + k).
    ks = jnp.arange(n_predictions, dtype=jnp.float32)
    times = t0[:, None] + ks[None, :]                             # [B, P]
    cos_T = jnp.cos(DAY_FREQ * times).T.astype(compute_dtype)     # [P, B]
    sin_T = jnp.sin(DAY_FREQ * times).T.astype(compute_dtype)     # [P, B]
    s0_T = flat_state.T.astype(compute_dtype)                     # [n_features, B]

    # Batch (lane axis) tiling and padding.
    b_tile, B_pad = _pick_batch_tile(B, b_tile)
    pad_b = B_pad - B
    P8 = _round_up(n_predictions, 8)                              # sublane-align trig rows
    s0_T = jnp.pad(s0_T, ((0, 0), (0, pad_b)))
    cos_T = jnp.pad(cos_T, ((0, P8 - n_predictions), (0, pad_b)))
    sin_T = jnp.pad(sin_T, ((0, P8 - n_predictions), (0, pad_b)))

    # First layer split: trig columns + bias kept f32-ish, state block on the MXU.
    W0 = weights[0].astype(jnp.float32)                           # [2+n_features, d_hidden]
    w0s_T = W0[2:, :].T.astype(compute_dtype)                     # [d_hidden, n_features]
    w0c = W0[0:1, :].T.astype(compute_dtype)                      # [d_hidden, 1]
    w0si = W0[1:2, :].T.astype(compute_dtype)                     # [d_hidden, 1]
    b0 = biases[0].astype(jnp.float32).reshape(-1, 1)             # [d_hidden, 1]

    # Remaining layers: transposed weights (feature-major), f32 biases; constant
    # index maps keep them VMEM-resident across the batch grid.
    wb_args, wb_specs = [], []
    for l in range(1, n_layers):
        wT = weights[l].T.astype(compute_dtype)                   # [d_out, d_in]
        b = biases[l].astype(jnp.float32).reshape(-1, 1)          # [d_out, 1]
        wb_args += [wT, b]
        wb_specs += [pl.BlockSpec(wT.shape, lambda i: (0, 0)),
                     pl.BlockSpec(b.shape, lambda i: (0, 0))]

    kernel = _make_kernel(n_layers, n_predictions, n_states, compute_dtype)
    n_out = n_predictions * n_states
    grid = (B_pad // b_tile,)

    out = pl.pallas_call(
        kernel,
        out_shape=jax.ShapeDtypeStruct((n_out, B_pad), jnp.float32),
        grid_spec=pltpu.PrefetchScalarGridSpec(
            num_scalar_prefetch=0,
            grid=grid,
            in_specs=[pl.BlockSpec((n_features, b_tile), lambda i: (0, i)),
                      pl.BlockSpec((P8, b_tile), lambda i: (0, i)),
                      pl.BlockSpec((P8, b_tile), lambda i: (0, i)),
                      pl.BlockSpec(w0s_T.shape, lambda i: (0, 0)),
                      pl.BlockSpec(w0c.shape, lambda i: (0, 0)),
                      pl.BlockSpec(w0si.shape, lambda i: (0, 0)),
                      pl.BlockSpec(b0.shape, lambda i: (0, 0))] + wb_specs,
            out_specs=pl.BlockSpec((n_out, b_tile), lambda i: (0, i)),
        ),
        compiler_params=pltpu.CompilerParams(
            dimension_semantics=("parallel",),
            vmem_limit_bytes=32 * 1024 * 1024),
    )(s0_T, cos_T, sin_T, w0s_T, w0c, w0si, b0, *wb_args)

    # kernel layout [n_predictions*n_states, B_pad] -> torch layout [B, n_states, P]
    out = out[:, :B].reshape(n_predictions, n_states, B)
    return jnp.transpose(out, (2, 1, 0))


def reference_forward(inputs, weights, biases,
                      n_states, n_prior_states, n_predictions,
                      compute_dtype=jnp.float32):
    """Pure-JAX reference mirroring the torch module (use_node=False)."""
    inputs = inputs.astype(jnp.float32)
    B = inputs.shape[0]
    time = inputs[:, 0, 0]
    feat = jnp.concatenate(
        [jnp.cos(DAY_FREQ * time)[:, None], jnp.sin(DAY_FREQ * time)[:, None],
         inputs[:, 1:, :].reshape(B, -1)], axis=-1)
    preds = []
    for _ in range(n_predictions):
        h = feat
        for w, b in zip(weights, biases):
            h = jnp.maximum(
                jnp.dot(h.astype(compute_dtype), w.astype(compute_dtype),
                        preferred_element_type=jnp.float32)
                + b[None, :].astype(jnp.float32), 0.0)
        time = time + 1.0
        preds.append(h[:, :n_states])
        feat = jnp.concatenate(
            [jnp.cos(DAY_FREQ * time)[:, None],
             jnp.sin(DAY_FREQ * time)[:, None], h], axis=-1)
    return jnp.stack(preds, axis=-1)


if __name__ == "__main__":
    # Small shapes consistent with the module.  B=300 exercises the multi-tile
    # batch grid (two 256-lane tiles on the "parallel" axis) plus lane padding.
    B = 300
    n_states = 4
    n_prior_states = 3
    n_predictions = 6
    n_layers = 2
    n_features = n_states * (1 + n_prior_states)      # 16
    d_in = 2 + n_features                             # 18

    key = jax.random.PRNGKey(0)
    k_in, *k_params = jax.random.split(key, 1 + 2 * n_layers)

    # inputs: [B, 1 + n_states, 1 + n_prior_states]; row 0 is time.
    inputs = jax.random.normal(
        k_in, (B, 1 + n_states, 1 + n_prior_states), dtype=jnp.float32) * 2.0
    inputs = inputs.at[:, 0, :].set(
        jnp.arange(B, dtype=jnp.float32)[:, None]
        + jnp.arange(1 + n_prior_states, dtype=jnp.float32)[None, :])

    # Deterministic Linear parameters (PyTorch-style uniform(+-1/sqrt(fan_in))),
    # stored as [in, out] so the math is x @ W + b.  All layers take d_in inputs;
    # the last layer outputs n_features (matching generate_dense_layers).
    weights, biases = [], []
    for l in range(n_layers):
        out_dim = n_features if l == n_layers - 1 else d_in
        bound = 1.0 / (d_in ** 0.5)
        w = jax.random.uniform(k_params[2 * l], (d_in, out_dim),
                               minval=-bound, maxval=bound, dtype=jnp.float32)
        b = jax.random.uniform(k_params[2 * l + 1], (out_dim,),
                               minval=-bound, maxval=bound, dtype=jnp.float32)
        weights.append(w)
        biases.append(b)

    common = dict(n_states=n_states, n_prior_states=n_prior_states,
                  n_predictions=n_predictions)

    # 1) Strict correctness check of the kernel structure in f32.
    run_f32 = functools.partial(weather_predictor_forward,
                                compute_dtype=jnp.float32, **common)
    out_f32 = jax.block_until_ready(run_f32(inputs, weights, biases))
    ref_f32 = reference_forward(inputs, weights, biases,
                                n_states, n_prior_states, n_predictions,
                                compute_dtype=jnp.float32)
    assert out_f32.shape == (B, n_states, n_predictions)
    assert jnp.allclose(out_f32, ref_f32, atol=1e-4, rtol=1e-4), \
        "f32 kernel mismatch vs JAX reference"

    # 2) Performance-default path: bf16 streams/weights with f32 accumulation,
    #    checked against a matching bf16-quantized reference.
    run_bf16 = functools.partial(weather_predictor_forward,
                                 compute_dtype=jnp.bfloat16, **common)
    out_bf16 = jax.block_until_ready(run_bf16(inputs, weights, biases))
    ref_bf16 = reference_forward(inputs, weights, biases,
                                 n_states, n_prior_states, n_predictions,
                                 compute_dtype=jnp.bfloat16)
    assert out_bf16.shape == (B, n_states, n_predictions)
    assert jnp.allclose(out_bf16, ref_bf16, atol=1e-2, rtol=1e-2), \
        "bf16 kernel mismatch vs bf16-matched JAX reference"

    print("KERNEL_OK")
</pallas_src>

<mosaic_0001>
module attributes {stable_mosaic.version = 11 : i64} {
  func.func @kernel(%arg0: i32, %arg1: memref<16x256xf32, #tpu.memory_space<vmem>>, %arg2: memref<8x256xf32, #tpu.memory_space<vmem>>, %arg3: memref<8x256xf32, #tpu.memory_space<vmem>>, %arg4: memref<18x16xf32, #tpu.memory_space<vmem>>, %arg5: memref<18x1xf32, #tpu.memory_space<vmem>>, %arg6: memref<18x1xf32, #tpu.memory_space<vmem>>, %arg7: memref<18x1xf32, #tpu.memory_space<vmem>>, %arg8: memref<16x18xf32, #tpu.memory_space<vmem>>, %arg9: memref<16x1xf32, #tpu.memory_space<vmem>>, %arg10: memref<24x256xf32, #tpu.memory_space<vmem>>) attributes {dimension_semantics = [#tpu.dimension_semantics<parallel>], iteration_bounds = array<i64: 2>, scalar_prefetch = 0 : i64, scratch_operands = 0 : i64, tpu.core_type = #tpu.core_type<tc>, window_params = [{transform_indices = @transform_0, window_bounds = array<i64: 16, 256>}, {transform_indices = @transform_1, window_bounds = array<i64: 8, 256>}, {transform_indices = @transform_2, window_bounds = array<i64: 8, 256>}, {pipeline_mode = #tpu.pipeline_mode<synchronous>, transform_indices = @transform_3, window_bounds = array<i64: 18, 16>}, {pipeline_mode = #tpu.pipeline_mode<synchronous>, transform_indices = @transform_4, window_bounds = array<i64: 18, 1>}, {pipeline_mode = #tpu.pipeline_mode<synchronous>, transform_indices = @transform_5, window_bounds = array<i64: 18, 1>}, {pipeline_mode = #tpu.pipeline_mode<synchronous>, transform_indices = @transform_6, window_bounds = array<i64: 18, 1>}, {pipeline_mode = #tpu.pipeline_mode<synchronous>, transform_indices = @transform_7, window_bounds = array<i64: 16, 18>}, {pipeline_mode = #tpu.pipeline_mode<synchronous>, transform_indices = @transform_8, window_bounds = array<i64: 16, 1>}, {transform_indices = @transform_9, window_bounds = array<i64: 24, 256>}]} {
    %c0 = arith.constant 0 : index
    %c0_0 = arith.constant 0 : index
    %0 = vector.load %arg4[%c0, %c0_0] : memref<18x16xf32, #tpu.memory_space<vmem>>, vector<18x16xf32>
    %c0_1 = arith.constant 0 : index
    %c0_2 = arith.constant 0 : index
    %1 = vector.load %arg5[%c0_1, %c0_2] : memref<18x1xf32, #tpu.memory_space<vmem>>, vector<18x1xf32>
    %c0_3 = arith.constant 0 : index
    %c0_4 = arith.constant 0 : index
    %2 = vector.load %arg6[%c0_3, %c0_4] : memref<18x1xf32, #tpu.memory_space<vmem>>, vector<18x1xf32>
    %c0_5 = arith.constant 0 : index
    %c0_6 = arith.constant 0 : index
    %3 = vector.load %arg7[%c0_5, %c0_6] : memref<18x1xf32, #tpu.memory_space<vmem>>, vector<18x1xf32>
    %c0_7 = arith.constant 0 : index
    %c0_8 = arith.constant 0 : index
    %4 = vector.load %arg8[%c0_7, %c0_8] : memref<16x18xf32, #tpu.memory_space<vmem>>, vector<16x18xf32>
    %c0_9 = arith.constant 0 : index
    %c0_10 = arith.constant 0 : index
    %5 = vector.load %arg9[%c0_9, %c0_10] : memref<16x1xf32, #tpu.memory_space<vmem>>, vector<16x1xf32>
    %c0_11 = arith.constant 0 : index
    %c0_12 = arith.constant 0 : index
    %6 = vector.load %arg1[%c0_11, %c0_12] : memref<16x256xf32, #tpu.memory_space<vmem>>, vector<16x256xf32>
    %c0_13 = arith.constant 0 : index
    %c0_14 = arith.constant 0 : index
    %7 = vector.load %arg2[%c0_13, %c0_14] : memref<8x256xf32, #tpu.memory_space<vmem>>, vector<1x256xf32>
    %c0_15 = arith.constant 0 : index
    %c0_16 = arith.constant 0 : index
    %8 = vector.load %arg3[%c0_15, %c0_16] : memref<8x256xf32, #tpu.memory_space<vmem>>, vector<1x256xf32>
    %9 = vector.broadcast %1 : vector<18x1xf32> to vector<18x256xf32>
    %10 = vector.broadcast %7 : vector<1x256xf32> to vector<18x256xf32>
    %11 = arith.mulf %9, %10 : vector<18x256xf32>
    %12 = vector.broadcast %2 : vector<18x1xf32> to vector<18x256xf32>
    %13 = vector.broadcast %8 : vector<1x256xf32> to vector<18x256xf32>
    %14 = arith.mulf %12, %13 : vector<18x256xf32>
    %15 = arith.addf %11, %14 : vector<18x256xf32>
    %16 = vector.broadcast %3 : vector<18x1xf32> to vector<18x256xf32>
    %17 = arith.addf %15, %16 : vector<18x256xf32>
    %cst = arith.constant dense<0.000000e+00> : vector<18x256xf32>
    %18 = tpu.matmul %0, %6, %cst {dimension_numbers = #tpu.dot_dimension_numbers<[1], [0], [0], [1], [0, 0, 1, 1], [], []>} : vector<18x16xf32>, vector<16x256xf32>, vector<18x256xf32> -> vector<18x256xf32>
    %19 = arith.addf %18, %17 : vector<18x256xf32>
    %cst_17 = arith.constant 0.000000e+00 : f32
    %20 = vector.broadcast %cst_17 : f32 to vector<18x256xf32>
    %21 = arith.maximumf %19, %20 : vector<18x256xf32>
    %cst_18 = arith.constant dense<0.000000e+00> : vector<16x256xf32>
    %22 = tpu.matmul %4, %21, %cst_18 {dimension_numbers = #tpu.dot_dimension_numbers<[1], [0], [0], [1], [0, 0, 1, 1], [], []>} : vector<16x18xf32>, vector<18x256xf32>, vector<16x256xf32> -> vector<16x256xf32>
    %23 = vector.broadcast %5 : vector<16x1xf32> to vector<16x256xf32>
    %24 = arith.addf %22, %23 : vector<16x256xf32>
    %cst_19 = arith.constant 0.000000e+00 : f32
    %25 = vector.broadcast %cst_19 : f32 to vector<16x256xf32>
    %26 = arith.maximumf %24, %25 : vector<16x256xf32>
    %27 = vector.extract_strided_slice %26 {offsets = [0, 0], sizes = [4, 256], strides = [1, 1]} : vector<16x256xf32> to vector<4x256xf32>
    %c0_20 = arith.constant 0 : index
    %c0_21 = arith.constant 0 : index
    %28 = vector.load %arg10[%c0_20, %c0_21] : memref<24x256xf32, #tpu.memory_space<vmem>>, vector<4x256xf32>
    tpu.vector_store %arg10[%c0_20, %c0_21], %27 {strides = array<i32>} : memref<24x256xf32, #tpu.memory_space<vmem>>, vector<4x256xf32>,
    %c1 = arith.constant 1 : index
    %c0_22 = arith.constant 0 : index
    %29 = vector.load %arg2[%c1, %c0_22] : memref<8x256xf32, #tpu.memory_space<vmem>>, vector<1x256xf32>
    %c1_23 = arith.constant 1 : index
    %c0_24 = arith.constant 0 : index
    %30 = vector.load %arg3[%c1_23, %c0_24] : memref<8x256xf32, #tpu.memory_space<vmem>>, vector<1x256xf32>
    %31 = vector.broadcast %1 : vector<18x1xf32> to vector<18x256xf32>
    %32 = vector.broadcast %29 : vector<1x256xf32> to vector<18x256xf32>
    %33 = arith.mulf %31, %32 : vector<18x256xf32>
    %34 = vector.broadcast %2 : vector<18x1xf32> to vector<18x256xf32>
    %35 = vector.broadcast %30 : vector<1x256xf32> to vector<18x256xf32>
    %36 = arith.mulf %34, %35 : vector<18x256xf32>
    %37 = arith.addf %33, %36 : vector<18x256xf32>
    %38 = vector.broadcast %3 : vector<18x1xf32> to vector<18x256xf32>
    %39 = arith.addf %37, %38 : vector<18x256xf32>
    %cst_25 = arith.constant dense<0.000000e+00> : vector<18x256xf32>
    %40 = tpu.matmul %0, %26, %cst_25 {dimension_numbers = #tpu.dot_dimension_numbers<[1], [0], [0], [1], [0, 0, 1, 1], [], []>} : vector<18x16xf32>, vector<16x256xf32>, vector<18x256xf32> -> vector<18x256xf32>
    %41 = arith.addf %40, %39 : vector<18x256xf32>
    %cst_26 = arith.constant 0.000000e+00 : f32
    %42 = vector.broadcast %cst_26 : f32 to vector<18x256xf32>
    %43 = arith.maximumf %41, %42 : vector<18x256xf32>
    %cst_27 = arith.constant dense<0.000000e+00> : vector<16x256xf32>
    %44 = tpu.matmul %4, %43, %cst_27 {dimension_numbers = #tpu.dot_dimension_numbers<[1], [0], [0], [1], [0, 0, 1, 1], [], []>} : vector<16x18xf32>, vector<18x256xf32>, vector<16x256xf32> -> vector<16x256xf32>
    %45 = vector.broadcast %5 : vector<16x1xf32> to vector<16x256xf32>
    %46 = arith.addf %44, %45 : vector<16x256xf32>
    %cst_28 = arith.constant 0.000000e+00 : f32
    %47 = vector.broadcast %cst_28 : f32 to vector<16x256xf32>
    %48 = arith.maximumf %46, %47 : vector<16x256xf32>
    %49 = vector.extract_strided_slice %48 {offsets = [0, 0], sizes = [4, 256], strides = [1, 1]} : vector<16x256xf32> to vector<4x256xf32>
    %c4 = arith.constant 4 : index
    %c0_29 = arith.constant 0 : index
    %50 = vector.load %arg10[%c4, %c0_29] : memref<24x256xf32, #tpu.memory_space<vmem>>, vector<4x256xf32>
    tpu.vector_store %arg10[%c4, %c0_29], %49 {strides = array<i32>} : memref<24x256xf32, #tpu.memory_space<vmem>>, vector<4x256xf32>,
    %c2 = arith.constant 2 : index
    %c0_30 = arith.constant 0 : index
    %51 = vector.load %arg2[%c2, %c0_30] : memref<8x256xf32, #tpu.memory_space<vmem>>, vector<1x256xf32>
    %c2_31 = arith.constant 2 : index
    %c0_32 = arith.constant 0 : index
    %52 = vector.load %arg3[%c2_31, %c0_32] : memref<8x256xf32, #tpu.memory_space<vmem>>, vector<1x256xf32>
    %53 = vector.broadcast %1 : vector<18x1xf32> to vector<18x256xf32>
    %54 = vector.broadcast %51 : vector<1x256xf32> to vector<18x256xf32>
    %55 = arith.mulf %53, %54 : vector<18x256xf32>
    %56 = vector.broadcast %2 : vector<18x1xf32> to vector<18x256xf32>
    %57 = vector.broadcast %52 : vector<1x256xf32> to vector<18x256xf32>
    %58 = arith.mulf %56, %57 : vector<18x256xf32>
    %59 = arith.addf %55, %58 : vector<18x256xf32>
    %60 = vector.broadcast %3 : vector<18x1xf32> to vector<18x256xf32>
    %61 = arith.addf %59, %60 : vector<18x256xf32>
    %cst_33 = arith.constant dense<0.000000e+00> : vector<18x256xf32>
    %62 = tpu.matmul %0, %48, %cst_33 {dimension_numbers = #tpu.dot_dimension_numbers<[1], [0], [0], [1], [0, 0, 1, 1], [], []>} : vector<18x16xf32>, vector<16x256xf32>, vector<18x256xf32> -> vector<18x256xf32>
    %63 = arith.addf %62, %61 : vector<18x256xf32>
    %cst_34 = arith.constant 0.000000e+00 : f32
    %64 = vector.broadcast %cst_34 : f32 to vector<18x256xf32>
    %65 = arith.maximumf %63, %64 : vector<18x256xf32>
    %cst_35 = arith.constant dense<0.000000e+00> : vector<16x256xf32>
    %66 = tpu.matmul %4, %65, %cst_35 {dimension_numbers = #tpu.dot_dimension_numbers<[1], [0], [0], [1], [0, 0, 1, 1], [], []>} : vector<16x18xf32>, vector<18x256xf32>, vector<16x256xf32> -> vector<16x256xf32>
    %67 = vector.broadcast %5 : vector<16x1xf32> to vector<16x256xf32>
    %68 = arith.addf %66, %67 : vector<16x256xf32>
    %cst_36 = arith.constant 0.000000e+00 : f32
    %69 = vector.broadcast %cst_36 : f32 to vector<16x256xf32>
    %70 = arith.maximumf %68, %69 : vector<16x256xf32>
    %71 = vector.extract_strided_slice %70 {offsets = [0, 0], sizes = [4, 256], strides = [1, 1]} : vector<16x256xf32> to vector<4x256xf32>
    %c8 = arith.constant 8 : index
    %c0_37 = arith.constant 0 : index
    %72 = vector.load %arg10[%c8, %c0_37] : memref<24x256xf32, #tpu.memory_space<vmem>>, vector<4x256xf32>
    tpu.vector_store %arg10[%c8, %c0_37], %71 {strides = array<i32>} : memref<24x256xf32, #tpu.memory_space<vmem>>, vector<4x256xf32>,
    %c3 = arith.constant 3 : index
    %c0_38 = arith.constant 0 : index
    %73 = vector.load %arg2[%c3, %c0_38] : memref<8x256xf32, #tpu.memory_space<vmem>>, vector<1x256xf32>
    %c3_39 = arith.constant 3 : index
    %c0_40 = arith.constant 0 : index
    %74 = vector.load %arg3[%c3_39, %c0_40] : memref<8x256xf32, #tpu.memory_space<vmem>>, vector<1x256xf32>
    %75 = vector.broadcast %1 : vector<18x1xf32> to vector<18x256xf32>
    %76 = vector.broadcast %73 : vector<1x256xf32> to vector<18x256xf32>
    %77 = arith.mulf %75, %76 : vector<18x256xf32>
    %78 = vector.broadcast %2 : vector<18x1xf32> to vector<18x256xf32>
    %79 = vector.broadcast %74 : vector<1x256xf32> to vector<18x256xf32>
    %80 = arith.mulf %78, %79 : vector<18x256xf32>
    %81 = arith.addf %77, %80 : vector<18x256xf32>
    %82 = vector.broadcast %3 : vector<18x1xf32> to vector<18x256xf32>
    %83 = arith.addf %81, %82 : vector<18x256xf32>
    %cst_41 = arith.constant dense<0.000000e+00> : vector<18x256xf32>
    %84 = tpu.matmul %0, %70, %cst_41 {dimension_numbers = #tpu.dot_dimension_numbers<[1], [0], [0], [1], [0, 0, 1, 1], [], []>} : vector<18x16xf32>, vector<16x256xf32>, vector<18x256xf32> -> vector<18x256xf32>
    %85 = arith.addf %84, %83 : vector<18x256xf32>
    %cst_42 = arith.constant 0.000000e+00 : f32
    %86 = vector.broadcast %cst_42 : f32 to vector<18x256xf32>
    %87 = arith.maximumf %85, %86 : vector<18x256xf32>
    %cst_43 = arith.constant dense<0.000000e+00> : vector<16x256xf32>
    %88 = tpu.matmul %4, %87, %cst_43 {dimension_numbers = #tpu.dot_dimension_numbers<[1], [0], [0], [1], [0, 0, 1, 1], [], []>} : vector<16x18xf32>, vector<18x256xf32>, vector<16x256xf32> -> vector<16x256xf32>
    %89 = vector.broadcast %5 : vector<16x1xf32> to vector<16x256xf32>
    %90 = arith.addf %88, %89 : vector<16x256xf32>
    %cst_44 = arith.constant 0.000000e+00 : f32
    %91 = vector.broadcast %cst_44 : f32 to vector<16x256xf32>
    %92 = arith.maximumf %90, %91 : vector<16x256xf32>
    %93 = vector.extract_strided_slice %92 {offsets = [0, 0], sizes = [4, 256], strides = [1, 1]} : vector<16x256xf32> to vector<4x256xf32>
    %c12 = arith.constant 12 : index
    %c0_45 = arith.constant 0 : index
    %94 = vector.load %arg10[%c12, %c0_45] : memref<24x256xf32, #tpu.memory_space<vmem>>, vector<4x256xf32>
    tpu.vector_store %arg10[%c12, %c0_45], %93 {strides = array<i32>} : memref<24x256xf32, #tpu.memory_space<vmem>>, vector<4x256xf32>,
    %c4_46 = arith.constant 4 : index
    %c0_47 = arith.constant 0 : index
    %95 = vector.load %arg2[%c4_46, %c0_47] : memref<8x256xf32, #tpu.memory_space<vmem>>, vector<1x256xf32>
    %c4_48 = arith.constant 4 : index
    %c0_49 = arith.constant 0 : index
    %96 = vector.load %arg3[%c4_48, %c0_49] : memref<8x256xf32, #tpu.memory_space<vmem>>, vector<1x256xf32>
    %97 = vector.broadcast %1 : vector<18x1xf32> to vector<18x256xf32>
    %98 = vector.broadcast %95 : vector<1x256xf32> to vector<18x256xf32>
    %99 = arith.mulf %97, %98 : vector<18x256xf32>
    %100 = vector.broadcast %2 : vector<18x1xf32> to vector<18x256xf32>
    %101 = vector.broadcast %96 : vector<1x256xf32> to vector<18x256xf32>
    %102 = arith.mulf %100, %101 : vector<18x256xf32>
    %103 = arith.addf %99, %102 : vector<18x256xf32>
    %104 = vector.broadcast %3 : vector<18x1xf32> to vector<18x256xf32>
    %105 = arith.addf %103, %104 : vector<18x256xf32>
    %cst_50 = arith.constant dense<0.000000e+00> : vector<18x256xf32>
    %106 = tpu.matmul %0, %92, %cst_50 {dimension_numbers = #tpu.dot_dimension_numbers<[1], [0], [0], [1], [0, 0, 1, 1], [], []>} : vector<18x16xf32>, vector<16x256xf32>, vector<18x256xf32> -> vector<18x256xf32>
    %107 = arith.addf %106, %105 : vector<18x256xf32>
    %cst_51 = arith.constant 0.000000e+00 : f32
    %108 = vector.broadcast %cst_51 : f32 to vector<18x256xf32>
    %109 = arith.maximumf %107, %108 : vector<18x256xf32>
    %cst_52 = arith.constant dense<0.000000e+00> : vector<16x256xf32>
    %110 = tpu.matmul %4, %109, %cst_52 {dimension_numbers = #tpu.dot_dimension_numbers<[1], [0], [0], [1], [0, 0, 1, 1], [], []>} : vector<16x18xf32>, vector<18x256xf32>, vector<16x256xf32> -> vector<16x256xf32>
    %111 = vector.broadcast %5 : vector<16x1xf32> to vector<16x256xf32>
    %112 = arith.addf %110, %111 : vector<16x256xf32>
    %cst_53 = arith.constant 0.000000e+00 : f32
    %113 = vector.broadcast %cst_53 : f32 to vector<16x256xf32>
    %114 = arith.maximumf %112, %113 : vector<16x256xf32>
    %115 = vector.extract_strided_slice %114 {offsets = [0, 0], sizes = [4, 256], strides = [1, 1]} : vector<16x256xf32> to vector<4x256xf32>
    %c16 = arith.constant 16 : index
    %c0_54 = arith.constant 0 : index
    %116 = vector.load %arg10[%c16, %c0_54] : memref<24x256xf32, #tpu.memory_space<vmem>>, vector<4x256xf32>
    tpu.vector_store %arg10[%c16, %c0_54], %115 {strides = array<i32>} : memref<24x256xf32, #tpu.memory_space<vmem>>, vector<4x256xf32>,
    %c5 = arith.constant 5 : index
    %c0_55 = arith.constant 0 : index
    %117 = vector.load %arg2[%c5, %c0_55] : memref<8x256xf32, #tpu.memory_space<vmem>>, vector<1x256xf32>
    %c5_56 = arith.constant 5 : index
    %c0_57 = arith.constant 0 : index
    %118 = vector.load %arg3[%c5_56, %c0_57] : memref<8x256xf32, #tpu.memory_space<vmem>>, vector<1x256xf32>
    %119 = vector.broadcast %1 : vector<18x1xf32> to vector<18x256xf32>
    %120 = vector.broadcast %117 : vector<1x256xf32> to vector<18x256xf32>
    %121 = arith.mulf %119, %120 : vector<18x256xf32>
    %122 = vector.broadcast %2 : vector<18x1xf32> to vector<18x256xf32>
    %123 = vector.broadcast %118 : vector<1x256xf32> to vector<18x256xf32>
    %124 = arith.mulf %122, %123 : vector<18x256xf32>
    %125 = arith.addf %121, %124 : vector<18x256xf32>
    %126 = vector.broadcast %3 : vector<18x1xf32> to vector<18x256xf32>
    %127 = arith.addf %125, %126 : vector<18x256xf32>
    %cst_58 = arith.constant dense<0.000000e+00> : vector<18x256xf32>
    %128 = tpu.matmul %0, %114, %cst_58 {dimension_numbers = #tpu.dot_dimension_numbers<[1], [0], [0], [1], [0, 0, 1, 1], [], []>} : vector<18x16xf32>, vector<16x256xf32>, vector<18x256xf32> -> vector<18x256xf32>
    %129 = arith.addf %128, %127 : vector<18x256xf32>
    %cst_59 = arith.constant 0.000000e+00 : f32
    %130 = vector.broadcast %cst_59 : f32 to vector<18x256xf32>
    %131 = arith.maximumf %129, %130 : vector<18x256xf32>
    %cst_60 = arith.constant dense<0.000000e+00> : vector<16x256xf32>
    %132 = tpu.matmul %4, %131, %cst_60 {dimension_numbers = #tpu.dot_dimension_numbers<[1], [0], [0], [1], [0, 0, 1, 1], [], []>} : vector<16x18xf32>, vector<18x256xf32>, vector<16x256xf32> -> vector<16x256xf32>
    %133 = vector.broadcast %5 : vector<16x1xf32> to vector<16x256xf32>
    %134 = arith.addf %132, %133 : vector<16x256xf32>
    %cst_61 = arith.constant 0.000000e+00 : f32
    %135 = vector.broadcast %cst_61 : f32 to vector<16x256xf32>
    %136 = arith.maximumf %134, %135 : vector<16x256xf32>
    %137 = vector.extract_strided_slice %136 {offsets = [0, 0], sizes = [4, 256], strides = [1, 1]} : vector<16x256xf32> to vector<4x256xf32>
    %c20 = arith.constant 20 : index
    %c0_62 = arith.constant 0 : index
    %138 = vector.load %arg10[%c20, %c0_62] : memref<24x256xf32, #tpu.memory_space<vmem>>, vector<4x256xf32>
    tpu.vector_store %arg10[%c20, %c0_62], %137 {strides = array<i32>} : memref<24x256xf32, #tpu.memory_space<vmem>>, vector<4x256xf32>,
    return
  }
  func.func @transform_0(%arg0: i32) -> (i32, i32) {
    %c0_i32 = arith.constant 0 : i32
    %c0_i32_0 = arith.constant 0 : i32
    return %c0_i32, %arg0 : i32, i32
  }
  func.func @transform_1(%arg0: i32) -> (i32, i32) {
    %c0_i32 = arith.constant 0 : i32
    %c0_i32_0 = arith.constant 0 : i32
    return %c0_i32, %arg0 : i32, i32
  }
  func.func @transform_2(%arg0: i32) -> (i32, i32) {
    %c0_i32 = arith.constant 0 : i32
    %c0_i32_0 = arith.constant 0 : i32
    return %c0_i32, %arg0 : i32, i32
  }
  func.func @transform_3(%arg0: i32) -> (i32, i32) {
    %c0_i32 = arith.constant 0 : i32
    %c0_i32_0 = arith.constant 0 : i32
    %c0_i32_1 = arith.constant 0 : i32
    return %c0_i32, %c0_i32_0 : i32, i32
  }
  func.func @transform_4(%arg0: i32) -> (i32, i32) {
    %c0_i32 = arith.constant 0 : i32
    %c0_i32_0 = arith.constant 0 : i32
    %c0_i32_1 = arith.constant 0 : i32
    return %c0_i32, %c0_i32_0 : i32, i32
  }
  func.func @transform_5(%arg0: i32) -> (i32, i32) {
    %c0_i32 = arith.constant 0 : i32
    %c0_i32_0 = arith.constant 0 : i32
    %c0_i32_1 = arith.constant 0 : i32
    return %c0_i32, %c0_i32_0 : i32, i32
  }
  func.func @transform_6(%arg0: i32) -> (i32, i32) {
    %c0_i32 = arith.constant 0 : i32
    %c0_i32_0 = arith.constant 0 : i32
    %c0_i32_1 = arith.constant 0 : i32
    return %c0_i32, %c0_i32_0 : i32, i32
  }
  func.func @transform_7(%arg0: i32) -> (i32, i32) {
    %c0_i32 = arith.constant 0 : i32
    %c0_i32_0 = arith.constant 0 : i32
    %c0_i32_1 = arith.constant 0 : i32
    return %c0_i32, %c0_i32_0 : i32, i32
  }
  func.func @transform_8(%arg0: i32) -> (i32, i32) {
    %c0_i32 = arith.constant 0 : i32
    %c0_i32_0 = arith.constant 0 : i32
    %c0_i32_1 = arith.constant 0 : i32
    return %c0_i32, %c0_i32_0 : i32, i32
  }
  func.func @transform_9(%arg0: i32) -> (i32, i32) {
    %c0_i32 = arith.constant 0 : i32
    %c0_i32_0 = arith.constant 0 : i32
    return %c0_i32, %arg0 : i32, i32
  }
}

</mosaic_0001>

<bundles_post_ra>
// kernel: tpu_custom_call.1
= control target key start
LH: loop header
LB: loop body
LE: loop exit
PB: predicated region body
PF: predicated region fallthrough
CT: control target
= control target key end

     0   :  { %14 = vsyncpa [#allocation3], 0  ;;  %s2552_s0 = inlined_call_operand.hbm [shape: f32[16,512], index: 0, kind: input, shape index: {}]   ;;  %s2553_s1 = inlined_call_operand.vmem [shape: f32[8,512], index: 1, kind: input, shape index: {}]   ;;  %s2554_s2 = inlined_call_operand.vmem [shape: f32[8,512], index: 2, kind: input, shape index: {}]   ;;  %s2555_s3 = inlined_call_operand.vmem [shape: f32[18,16], index: 3, kind: input, shape index: {}]   ;;  %s2556_s4 = inlined_call_operand.vmem [shape: f32[18,1], index: 4, kind: input, shape index: {}]   ;;  %s2557_s5 = inlined_call_operand.vmem [shape: f32[18,1], index: 5, kind: input, shape index: {}]   ;;  %s2558_s6 = inlined_call_operand.vmem [shape: f32[18,1], index: 6, kind: input, shape index: {}]   ;;  %s2559_s7 = inlined_call_operand.vmem [shape: f32[16,18], index: 7, kind: input, shape index: {}]   ;;  %s2560_s8 = inlined_call_operand.vmem [shape: f32[16,1], index: 8, kind: input, shape index: {}]   ;;  %s2561_s9 = inlined_call_operand.hbm [shape: f32[24,512], index: 9, kind: output, shape index: {}]  }
   0x1   :  { %16 = vsyncpa [#allocation3 + $0x1], 0 }
   0x2   :  { %17 = vsyncpa [#allocation4], 0 }
   0x3   :  { %19 = vsyncpa [#allocation4 + $0x1], 0  ;;  %s1853_s30 = smov 0   ;;  %s1855_s10 = smov 0  }
   0x4   :  { %s1857_s11 = smov 0   ;;  %s1859_s12 = smov 0  }
   0x5 LB: > { %2567 = sst [smem:[#allocation8_spill]] %s1790_s11  ;;  %s1874_s13 = sadd.s32 4294967295, %s1794_s12   ;;  %s1794_s12 = sphi %s1859_s12, %s2597_s12   ;;  %s1790_s11 = sphi %s1857_s11, %s2599_s11   ;;  %s1786_s10 = sphi %s1855_s10, %s2601_s10   ;;  %s1782_s30 = sphi %s1853_s30, %s2600_s30  }
   0x6   : > { %s1541_s14 = sadd.s32 4294967294, %s1794_s12   ;;  %s1878_s15 = sadd.s32 1, %s1794_s12  }
   0x7   : > { %2568 = sst [smem:[#allocation9_spill]] %s1878_s15  ;;  %s32_s16 = sadd.s32 1, %s1790_s11 }
   0x8   : > { %s29_s17 = ssub.s32 %s1794_s12, %s1878_s15  ;;  %p39_p0 = scmp.ne.s32.totalorder %s1790_s11, %s1786_s10 }
   0x9   : > { %p30_p1 = scmp.eq.s32.totalorder %s29_s17, 0  ;;  %p40_p2 = scmp.eq.s32.totalorder %s1794_s12, 0 }
   0xa   : > { %p45_p3 = scmp.ne.s32.totalorder %s1786_s10, %s1782_s30  ;;  %p46_p4 = scmp.eq.s32.totalorder %s1874_s13, 0 }
   0xb   : > { %s1890_s18 = scalar_select %p30_p1, %s1790_s11, %s32_s16  }
   0xc   : > { %p1892_p5 = por %p40_p2, %p39_p0  ;;  %p1896_p6 = por %p46_p4, %p45_p3 }
   0xd   : > { %2569 = sst [smem:[#allocation10_spill]] %s1890_s18  ;;  %p247_p7 = scmp.eq.s32.totalorder %s1874_s13, 1 }
   0xe   : > { %p253_p8 = scmp.eq.s32.totalorder %s1541_s14, 1  ;;  %p1543_p9 = scmp.ge.s32.totalorder %s1794_s12, 2 }
   0xf   : > { %p1654_p10 = scmp.lt.s32.totalorder %s1794_s12, 2  ;;  %p1903_p11 = por %p247_p7, %p39_p0 }
  0x10   : > { %p1907_p12 = por %p253_p8, %p45_p3  ;;  %s291_s23 = sand.u32 1, %s1790_s11  }
  0x11   : > { %s1639_s24 = sshll.u32 %s1794_s12, 4  ;;  %s1544_s25 = sshll.u32 %s291_s23, 5 }
  0x12   : > { %s300_s28 = scalar_lea.hbm %s2552_s0, %s1639_s24  ;;  %s295_s16 = scalar_lea.vmem [#allocation2], %s1544_s25 }
  0x13   : > { %s301_s29 = sshll.u32 %s300_s28, 4  ;;  %s303_s14 = sshll.u32 %s295_s16, 4  ;;  %s302_s29 = int_to_ptr.hbm [resolvable:$true] %s301_s29  ;;  %s304_s14 = int_to_ptr.vmem [resolvable:$true] %s303_s14 }
  0x14   : > { %p1918_p13 = pnand %p1654_p10, %p1892_p5  ;;  %p1547_p0 = scmp.ge.s32.totalorder %s1794_s12, 1 }
  0x15   : > { %s292_s18 = scalar_lea.sflag [#allocation3], %s291_s23  ;;  %s1698_s11 = sshra.s32 %s302_s29, 4  ;;  %s1699_s11 = int_to_ptr.hbm [resolvable:$true] %s1698_s11 }
  0x16   : > { %s1700_s15 = scalar_lea.hbm %s1699_s11, 32  ;;  %p1702_p2 = pneg %p1918_p13 }
  0x17   : > { %p1701_p1 = scmp.ne.s32.totalorder %s1699_s11, %s1700_s15  ;;  %s1705_s26 = scalar_lea.hbm %s2552_s0, 64 }
  0x18   : > { %p1706_p5 = scmp.lt.s32.totalorder %s1699_s11, %s2552_s0  ;;  %p1707_p7 = scmp.lt.s32.totalorder %s1705_s26, %s1700_s15 }
  0x19   : > { %p1703_p3 = pnand %p1702_p2, %p1701_p1 }
  0x1a   : > { %p1708_p8 = por %p1707_p7, %p1706_p5 }
  0x1b   : > { %p1704_p4 = pneg %p1703_p3 }
  0x1d   : > { %p1709_p10 = pnand %p1708_p8, %p1704_p4 }
  0x1f   : > { %1712 = shalt.err (!%p1709_p10)
}
  0x20   : > { %s1796_s23 = smov 512   ;;  %s1797_s28 = smov 256  }
  0x21   : > { %s1798_s16 = smov 16   ;;  %p329_p1 = scmp.lt.s32.totalorder %s1794_s12, 3 }
  0x22   : > { %1649 = dma.hbm_to_vmem [thread:$0]  (!%p1918_p13), %s302_s29, 512, %s304_s14, %s292_s18, %s1796_s23, %s1797_s28, %s1798_s16  }
  0x23   : > { %p330_p2 = pnand %p1547_p0, %p329_p1 }
  0x25   : > { %333 = sbr.rel (%p330_p2) target bundleno = 1837 (0x72d), region = 56 }
  0x2a   : > { %s1937_s24 = sand.u32 1, %s1786_s10  }
  0x2b   : > { %s1548_s11 = sshll.u32 %s1937_s24, 5  ;;  %s336_s15 = scalar_lea.sflag [#allocation3], %s1937_s24 }
  0x2c   : > { %s339_s25 = scalar_lea.vmem [#allocation2], %s1548_s11 }
  0x2d   : > { %1773 = dma.done.wait (%p1896_p6), %s336_s15, 512  }
  0x2e   : > { %1775 = vsyncadd (%p1896_p6), %s336_s15, 4294966784  ;;  %v1799_v0 = vmov 0   ;;  %v417_v1 = vld [vmem:[%s339_s25 + $0x10] sm:$0xff]  ;;  %v418_v2 = vld [vmem:[%s339_s25 + $0x18] sm:$0xff]  ;;  %vm500_vm0 = vcmask 130048   ;;  %s1549_s18 = sshll.u32 %s1874_s13, 1 }
  0x2f   : > { %1696 = vset.pattern.permute.xlu1 %v1799_v0  ;;  %1695 = vset.pattern.permute.xlu0 %v1799_v0  ;;  %v404_v3 = vld [vmem:[%s2556_s4 + $0x10] sm:$0x3]  ;;  %v403_v4 = vld [vmem:[%s2556_s4 + $0x8] sm:$0xff]  ;;  %v415_v5 = vld [vmem:[%s339_s25] sm:$0xff]  ;;  %p387_p6 = scmp.lt.s32.totalorder %s1549_s18, 3  ;;  %vm585_vm1 = vcmask 1041408  }
  0x30   : > { %1697 = vset.pattern.permute.xlu2 %v1799_v0  ;;  %524 = vmatpush.msra.mxu0 %v417_v1  ;;  %v416_v6 = vld [vmem:[%s339_s25 + $0x8] sm:$0xff]  ;;  %v1954_v7 = vld [vmem:[%s2555_s3] sm:$0xff]  ;;  %v407_v9 = vld [vmem:[%s2557_s5 + $0x10] sm:$0x3]  ;;  %vm578_vm2 = vcmask 146432   ;;  %s1641_s15 = smul.u32 48, %s1937_s24 }
  0x31   : > { %550 = vmatpush.msra.mxu1 %v418_v2  ;;  %433 = vperm.xlu0 %1695, %v404_v3   ;;  %v402_v8 = vld [vmem:[%s2556_s4] sm:$0xff]  ;;  %v406_v10 = vld [vmem:[%s2557_s5 + $0x8] sm:$0xff]  ;;  %v410_v13 = vld [vmem:[%s2558_s6 + $0x10] sm:$0x3]  ;;  %s2603_s18 = smov (!%p387_p6, %s1549_s18), 3  ;;  %s1748_s16 = scalar_lea.hbm %s2561_s9, 96 }
  0x32   : > { %428 = vperm.xlu1 %1696, %v403_v4   ;;  %525 = vmatpush.msra.mxu0 %v415_v5  ;;  %v1972_v11 = vld [vmem:[%s2555_s3 + $0x8] sm:$0xff]  ;;  %v405_v12 = vld [vmem:[%s2557_s5] sm:$0xff]  ;;  %v1990_v15 = vld [vmem:[%s2555_s3 + $0x10] sm:$0x3]  ;;  %s1550_s29 = sshll.u32 %s2603_s18, 3  ;;  %s2342_s25 = scalar_lea.vmem [#allocation5], %s1641_s15 }
  0x33   : > { %551 = vmatpush.msra.mxu1 %v416_v6  ;;  %1553 = vmatmul.msk.f32.vlgmr.msra.gmra.mxu0 %vm500_vm0, %v1954_v7  ;;  %v409_v14 = vld [vmem:[%s2558_s6 + $0x8] sm:$0xff]  ;;  %2575 = vst [vmem:[#allocation11_spill] sm:$0xff] %v1990_v15  ;;  %v408_v16 = vld [vmem:[%s2558_s6] sm:$0xff]  ;;  %s2009_s20 = scalar_lea.vmem %s2553_s1, %s1550_s29  ;;  %s2014_s27 = scalar_lea.vmem %s2554_s2, %s1550_s29 }
  0x34   : > { %1556 = vmatmul.msk.f32.vlgmr.msra.gmra.mxu1 %vm500_vm0, %v1954_v7  ;;  %423 = vperm.xlu2 %1697, %v402_v8   ;;  %v414_v17 = vld [vmem:[%s2560_s8 + $0x8] sm:$0xff]  ;;  %v413_v18 = vld [vmem:[%s2560_s8] sm:$0xff]  ;;  %s1640_s18 = sshll.u32 %s1874_s13, 4  ;;  %s1429_s13 = scalar_lea.sflag [#allocation4], %s1937_s24 }
  0x35   : > { %v1565_v19 = vld [vmem:[%s2009_s20 + $0x1] ss:$8 sm:$0x3]  ;;  %v1579_v24 = vld [vmem:[%s2009_s20 + $0x2] ss:$8 sm:$0x3]  ;;  %s1440_s17 = scalar_lea.hbm %s2561_s9, %s1640_s18 }
  0x36   : > { %v1566_v20 = vld [vmem:[%s2014_s27 + $0x1] ss:$8 sm:$0x3]  ;;  %v2020_v22 = vperm.slane %v1565_v19, 0  ;;  %v2022_v23 = vperm.slane %v1565_v19, 1  ;;  %v2032_v29 = vperm.slane %v1579_v24, 0 }
  0x37   : > { %v1580_v25 = vld [vmem:[%s2014_s27 + $0x2] ss:$8 sm:$0x3]  ;;  %v2028_v27 = vperm.slane %v1566_v20, 0  ;;  %v2035_v31 = vperm.slane %v1566_v20, 1  ;;  %v2037_v32 = vperm.slane %v1579_v24, 1 }
  0x38   : > { %v1593_v30 = vld [vmem:[%s2009_s20 + $0x3] ss:$8 sm:$0x3]  ;;  %v2044_v36 = vperm.slane %v1580_v25, 0  ;;  %v2046_v37 = vperm.slane %v1580_v25, 1  ;;  %s1443_s26 = sshll.u32 %s1440_s17, 4  ;;  %s1444_s26 = int_to_ptr.hbm [resolvable:$true] %s1443_s26 }
  0x39   : > { %459 = vperm.xlu0 %1695, %v407_v9   ;;  %v1594_v33 = vld [vmem:[%s2014_s27 + $0x3] ss:$8 sm:$0x3]  ;;  %v2040_v34 = vperm.slane %v1593_v30, 0  ;;  %v2048_v38 = vperm.slane %v1593_v30, 1  ;;  %s1742_s19 = sshra.s32 %s1444_s26, 4  ;;  %s1743_s19 = int_to_ptr.hbm [resolvable:$true] %s1742_s19 }
  0x3a   : > { %454 = vperm.xlu1 %1696, %v406_v10   ;;  %v2054_v41 = vperm.slane %v1594_v33, 0  ;;  %v2056_v42 = vperm.slane %v1594_v33, 1  ;;  %v1607_v44 = vld [vmem:[%s2009_s20 + $0x4] ss:$8 sm:$0x3]  ;;  %p1749_p4 = scmp.lt.s32.totalorder %s1743_s19, %s2561_s9 }
  0x3b   : > { %1554 = vmatmul.msk.f32.gmra.mxu0 %vm500_vm0, %v1972_v11  ;;  %v1608_v45 = vld [vmem:[%s2014_s27 + $0x4] ss:$8 sm:$0x3]  ;;  %v2064_v47 = vperm.slane %v1607_v44, 0  ;;  %v2072_v51 = vperm.slane %v1607_v44, 1 }
  0x3c   : > { %1557 = vmatmul.msk.f32.gmra.mxu1 %vm500_vm0, %v1972_v11  ;;  %449 = vperm.xlu2 %1697, %v405_v12   ;;  %v2066_v48 = vperm.slane %v1608_v45, 0  ;;  %v2074_v52 = vperm.slane %v1608_v45, 1  ;;  %v1621_v59 = vld [vmem:[%s2009_s20 + $0x5] ss:$8 sm:$0x3] }
  0x3d   : > { %v1622_v60 = vld [vmem:[%s2014_s27 + $0x5] ss:$8 sm:$0x3]  ;;  %v1277_v5 = vperm.slane %v1621_v59, 0  ;;  %v1278_v8 = vperm.slane %v1621_v59, 1 }
  0x3e   : > { %v2094_v6 = vperm.slane %v1622_v60, 0  ;;  %v2096_v9 = vperm.slane %v1622_v60, 1  ;;  %v419_v30 = vld [vmem:[%s2009_s20] ss:$8 sm:$0x3]  ;;  %s1441_s20 = sshll.u32 %s2342_s25, 4  ;;  %s1442_s20 = int_to_ptr.vmem [resolvable:$true] %s1441_s20 }
  0x3f   : > { %v420_v33 = vld [vmem:[%s2014_s27] ss:$8 sm:$0x3]  ;;  %s1744_s27 = scalar_lea.hbm %s1743_s19, 48 }
  0x40   : > { %p1745_p13 = scmp.ne.s32.totalorder %s1743_s19, %s1744_s27  ;;  %p1750_p5 = scmp.lt.s32.totalorder %s1748_s16, %s1744_s27 }
  0x41   : > { %491 = vperm.xlu0 %1695, %v410_v13  }
  0x42   : > { %486 = vperm.xlu1 %1696, %v409_v14   ;;  %p1746_p0 = pnand %p1745_p13, %p1903_p11  ;;  %p1751_p7 = por %p1750_p5, %p1749_p4 }
  0x43   : > { %1555 = vmatmul.msk.f32.gmra.mxu0 %vm500_vm0, %v1990_v15 }
  0x44   : > { %1558 = vmatmul.msk.f32.gmra.mxu1 %vm500_vm0, %v1990_v15  ;;  %481 = vperm.xlu2 %1697, %v408_v16   ;;  %p1747_p3 = pneg %p1746_p0 }
  0x46   : > { %p1752_p8 = pnand %p1751_p7, %p1747_p3 }
  0x49   : > { %575 = vperm.xlu0 %1695, %v414_v17  }
  0x4a   : > { %570 = vperm.xlu1 %1696, %v413_v18  }
  0x8e   : > { %v2018_v21 = vpop.permute.xlu2 %423 }
  0x8f   : > { %v653_v26 = vmul.f32 %v2020_v22, %v2018_v21  ;;  %v654_v28 = vmul.f32 %v2022_v23, %v2018_v21  ;;  %v813_v35 = vmul.f32 %v2032_v29, %v2018_v21  ;;  %v814_v39 = vmul.f32 %v2037_v32, %v2018_v21 }
  0x90   : > { %v967_v40 = vmul.f32 %v2040_v34, %v2018_v21  ;;  %v968_v43 = vmul.f32 %v2048_v38, %v2018_v21  ;;  %v1127_v1 = vmul.f32 %v2064_v47, %v2018_v21  ;;  %v1128_v3 = vmul.f32 %v2072_v51, %v2018_v21 }
  0x91   : > { %v1281_v14 = vmul.f32 %v1277_v5, %v2018_v21  ;;  %v1282_v17 = vmul.f32 %v1278_v8, %v2018_v21 }
  0x96   : > { %v2062_v46 = vpop.permute.xlu2 %449 }
  0x97   : > { %v664_v49 = vmul.f32 %v2028_v27, %v2062_v46  ;;  %v665_v50 = vmul.f32 %v2035_v31, %v2062_v46  ;;  %v824_v53 = vmul.f32 %v2044_v36, %v2062_v46  ;;  %v825_v54 = vmul.f32 %v2046_v37, %v2062_v46 }
  0x98   : > { %v978_v55 = vmul.f32 %v2054_v41, %v2062_v46  ;;  %v979_v56 = vmul.f32 %v2056_v42, %v2062_v46  ;;  %v1138_v2 = vmul.f32 %v2066_v48, %v2062_v46  ;;  %v1139_v4 = vmul.f32 %v2074_v52, %v2062_v46 }
  0x99   : > { %v670_v57 = vadd.f32 %v664_v49, %v653_v26  ;;  %v671_v58 = vadd.f32 %v665_v50, %v654_v28  ;;  %v830_v61 = vadd.f32 %v824_v53, %v813_v35  ;;  %v831_v62 = vadd.f32 %v825_v54, %v814_v39 }
  0x9a   : > { %v984_v63 = vadd.f32 %v978_v55, %v967_v40  ;;  %v985_v0 = vadd.f32 %v979_v56, %v968_v43  ;;  %v1144_v10 = vadd.f32 %v1138_v2, %v1127_v1  ;;  %v1145_v12 = vadd.f32 %v1139_v4, %v1128_v3 }
  0x9b   : > { %v1292_v16 = vmul.f32 %v2094_v6, %v2062_v46  ;;  %v1293_v18 = vmul.f32 %v2096_v9, %v2062_v46  ;;  %v437_v53 = vperm.slane %v419_v30, 0  ;;  %v2140_v54 = vperm.slane %v420_v33, 0 }
  0x9c   : > { %v438_v55 = vperm.slane %v419_v30, 1  ;;  %v464_v56 = vperm.slane %v420_v33, 1 }
  0x9d   : > { %v1298_v40 = vadd.f32 %v1292_v16, %v1281_v14  ;;  %v1299_v43 = vadd.f32 %v1293_v18, %v1282_v17 }
  0x9e   : > { %v2098_v13 = vpop.permute.xlu2 %481  ;;  %v442_v17 = vmul.f32 %v438_v55, %v2018_v21  ;;  %v468_v18 = vmul.f32 %v464_v56, %v2062_v46 }
  0x9f   : > { %v2107_v19 = vadd.f32 %v670_v57, %v2098_v13  ;;  %v2110_v20 = vadd.f32 %v671_v58, %v2098_v13  ;;  %v2113_v24 = vadd.f32 %v830_v61, %v2098_v13  ;;  %v2116_v25 = vadd.f32 %v831_v62, %v2098_v13 }
  0xa0   : > { %v2119_v26 = vadd.f32 %v984_v63, %v2098_v13  ;;  %v2122_v28 = vadd.f32 %v985_v0, %v2098_v13  ;;  %v2127_v35 = vadd.f32 %v1144_v10, %v2098_v13  ;;  %v2130_v39 = vadd.f32 %v1145_v12, %v2098_v13 }
  0xa1   : > { %2576 = vst [vmem:[#allocation12_spill] sm:$0xff] %v2107_v19  ;;  %v2135_v49 = vadd.f32 %v1298_v40, %v2098_v13  ;;  %v2138_v50 = vadd.f32 %v1299_v43, %v2098_v13 }
  0xa2   : > { %2577 = vst [vmem:[#allocation13_spill] sm:$0xff] %v2110_v20 }
  0xa3   : > { %2578 = vst [vmem:[#allocation14_spill] sm:$0xff] %v2113_v24  ;;  %v2132_v44 = vpop.permute.xlu0 %433 }
  0xa4   : > { %2579 = vst [vmem:[#allocation15_spill] sm:$0xff] %v2116_v25  ;;  %v429_v45 = vpop.permute.xlu1 %428  ;;  %v657_v59 = vmul.f32 %v2020_v22, %v2132_v44  ;;  %v658_v60 = vmul.f32 %v2022_v23, %v2132_v44  ;;  %v817_v63 = vmul.f32 %v2032_v29, %v2132_v44  ;;  %v818_v0 = vmul.f32 %v2037_v32, %v2132_v44 }
  0xa5   : > { %2580 = vst [vmem:[#allocation16_spill] sm:$0xff] %v2119_v26  ;;  %v655_v57 = vmul.f32 %v2020_v22, %v429_v45  ;;  %v656_v58 = vmul.f32 %v2022_v23, %v429_v45  ;;  %v815_v61 = vmul.f32 %v2032_v29, %v429_v45  ;;  %v816_v62 = vmul.f32 %v2037_v32, %v429_v45 }
  0xa6   : > { %2581 = vst [vmem:[#allocation17_spill] sm:$0xff] %v2122_v28  ;;  %v969_v1 = vmul.f32 %v2040_v34, %v429_v45  ;;  %v970_v2 = vmul.f32 %v2048_v38, %v429_v45  ;;  %v2158_v22 = vmul.f32 %v2040_v34, %v2132_v44  ;;  %v2162_v23 = vmul.f32 %v2048_v38, %v2132_v44 }
  0xa7   : > { %2582 = vst [vmem:[#allocation18_spill] sm:$0xff] %v2127_v35  ;;  %v2165_v3 = vmul.f32 %v2064_v47, %v429_v45  ;;  %v2168_v29 = vmul.f32 %v2072_v51, %v429_v45  ;;  %v2172_v32 = vmul.f32 %v2064_v47, %v2132_v44  ;;  %v2176_v4 = vmul.f32 %v2072_v51, %v2132_v44 }
  0xa8   : > { %2583 = vst [vmem:[#allocation19_spill] sm:$0xff] %v2130_v39  ;;  %v2178_v34 = vmul.f32 %v1277_v5, %v429_v45  ;;  %v2180_v10 = vmul.f32 %v1278_v8, %v429_v45  ;;  %v2183_v38 = vmul.f32 %v1277_v5, %v2132_v44  ;;  %v2186_v12 = vmul.f32 %v1278_v8, %v2132_v44 }
  0xa9   : > { %2584 = vst [vmem:[#allocation20_spill] sm:$0xff] %v2135_v49  ;;  %v441_v47 = vmul.f32 %v437_v53, %v2018_v21  ;;  %v467_v51 = vmul.f32 %v2140_v54, %v2062_v46  ;;  %v443_v40 = vmul.f32 %v437_v53, %v429_v45  ;;  %v446_v19 = vmul.f32 %v438_v55, %v2132_v44 }
  0xaa   : > { %2585 = vst [vmem:[#allocation21_spill] sm:$0xff] %v2138_v50  ;;  %v444_v50 = vmul.f32 %v438_v55, %v429_v45 }
  0xab   : > { %v2188_v14 = vpop.permute.xlu0 %459 }
  0xac   : > { %v2190_v16 = vpop.permute.xlu1 %454  ;;  %v668_v30 = vmul.f32 %v2028_v27, %v2188_v14  ;;  %v669_v33 = vmul.f32 %v2035_v31, %v2188_v14  ;;  %v828_v25 = vmul.f32 %v2044_v36, %v2188_v14  ;;  %v829_v45 = vmul.f32 %v2046_v37, %v2188_v14 }
  0xad   : > { %v666_v5 = vmul.f32 %v2028_v27, %v2190_v16  ;;  %v667_v8 = vmul.f32 %v2035_v31, %v2190_v16  ;;  %v469_v43 = vmul.f32 %v2140_v54, %v2190_v16  ;;  %v470_v21 = vmul.f32 %v464_v56, %v2190_v16 }
  0xae   : > { %v674_v39 = vadd.f32 %v668_v30, %v657_v59  ;;  %v675_v35 = vadd.f32 %v669_v33, %v658_v60  ;;  %v826_v27 = vmul.f32 %v2044_v36, %v2190_v16  ;;  %v827_v31 = vmul.f32 %v2046_v37, %v2190_v16 }
  0xaf   : > { %v672_v46 = vadd.f32 %v666_v5, %v655_v57  ;;  %v673_v49 = vadd.f32 %v667_v8, %v656_v58  ;;  %v473_v57 = vadd.f32 %v467_v51, %v441_v47  ;;  %v474_v58 = vadd.f32 %v468_v18, %v442_v17 }
  0xb0   : > { %v2208_v28 = vpop.f32.mrf.mxu0  ;;  %v980_v59 = vmul.f32 %v2054_v41, %v2190_v16  ;;  %v981_v60 = vmul.f32 %v2056_v42, %v2190_v16  ;;  %v832_v5 = vadd.f32 %v826_v27, %v815_v61  ;;  %v833_v8 = vadd.f32 %v827_v31, %v816_v62 }
  0xb1   : > { %v2210_v26 = vpop.f32.mrf.mxu1  ;;  %v834_v30 = vadd.f32 %v828_v25, %v817_v63  ;;  %v835_v33 = vadd.f32 %v829_v45, %v818_v0  ;;  %v445_v36 = vmul.f32 %v437_v53, %v2132_v44  ;;  %v475_v51 = vadd.f32 %v469_v43, %v443_v40 }
  0xb2   : > { %v986_v37 = vadd.f32 %v980_v59, %v969_v1  ;;  %v987_v47 = vadd.f32 %v981_v60, %v970_v2  ;;  %v476_v17 = vadd.f32 %v470_v21, %v444_v50  ;;  %v471_v18 = vmul.f32 %v2140_v54, %v2188_v14 }
  0xb3   : > { %v2224_v24 = vpop.permute.xlu0 %491  ;;  %v472_v15 = vmul.f32 %v464_v56, %v2188_v14  ;;  %v1140_v1 = vmul.f32 %v2066_v48, %v2190_v16  ;;  %v1141_v2 = vmul.f32 %v2074_v52, %v2190_v16  ;;  %v1142_v40 = vmul.f32 %v2066_v48, %v2188_v14 }
  0xb4   : > { %v487_v20 = vpop.permute.xlu1 %486  ;;  %v2236_v62 = vadd.f32 %v674_v39, %v2224_v24  ;;  %v2239_v53 = vadd.f32 %v675_v35, %v2224_v24  ;;  %v2246_v50 = vadd.f32 %v834_v30, %v2224_v24  ;;  %v2249_v54 = vadd.f32 %v835_v33, %v2224_v24 }
  0xb5   : > { %v2231_v61 = vadd.f32 %v672_v46, %v487_v20  ;;  %v2233_v25 = vadd.f32 %v673_v49, %v487_v20  ;;  %v2241_v44 = vadd.f32 %v832_v5, %v487_v20  ;;  %v2243_v55 = vadd.f32 %v833_v8, %v487_v20 }
  0xb6   : > { %v2251_v56 = vadd.f32 %v986_v37, %v487_v20  ;;  %v2253_v49 = vadd.f32 %v987_v47, %v487_v20  ;;  %v982_v39 = vmul.f32 %v2054_v41, %v2188_v14  ;;  %v983_v35 = vmul.f32 %v2056_v42, %v2188_v14 }
  0xb7   : > { %v1143_v43 = vmul.f32 %v2074_v52, %v2188_v14  ;;  %v477_v21 = vadd.f32 %v471_v18, %v445_v36  ;;  %v478_v46 = vadd.f32 %v472_v15, %v446_v19  ;;  %v1146_v27 = vadd.f32 %v1140_v1, %v2165_v3 }
  0xb8   : > { %v530_v63 = vpop.f32.mrf.mxu0  ;;  %v988_v41 = vadd.f32 %v982_v39, %v2158_v22  ;;  %v989_v42 = vadd.f32 %v983_v35, %v2162_v23  ;;  %v1147_v31 = vadd.f32 %v1141_v2, %v2168_v29  ;;  %v1148_v45 = vadd.f32 %v1142_v40, %v2172_v32 }
  0xb9   : > { %v556_v0 = vpop.f32.mrf.mxu1  ;;  %v1149_v59 = vadd.f32 %v1143_v43, %v2176_v4  ;;  %v494_v60 = vadd.f32 %v2098_v13, %v473_v57  ;;  %v495_v48 = vadd.f32 %v2098_v13, %v474_v58  ;;  %v2281_v19 = vadd.f32 %v1146_v27, %v487_v20 }
  0xba   : > { %v2276_v52 = vadd.f32 %v988_v41, %v2224_v24  ;;  %v2279_v15 = vadd.f32 %v989_v42, %v2224_v24  ;;  %v2283_v22 = vadd.f32 %v1147_v31, %v487_v20  ;;  %v2286_v23 = vadd.f32 %v1148_v45, %v2224_v24 }
  0xbb   : > { %v2289_v3 = vadd.f32 %v1149_v59, %v2224_v24  ;;  %v1294_v29 = vmul.f32 %v2094_v6, %v2190_v16  ;;  %v1295_v13 = vmul.f32 %v2096_v9, %v2190_v16  ;;  %v1296_v32 = vmul.f32 %v2094_v6, %v2188_v14  ;;  %v2346_v42 = vpop.permute.xlu0 %575 }
  0xbc   : > { %v1297_v4 = vmul.f32 %v2096_v9, %v2188_v14  ;;  %v496_v57 = vadd.f32 %v487_v20, %v475_v51  ;;  %v497_v58 = vadd.f32 %v487_v20, %v476_v17  ;;  %v498_v5 = vadd.f32 %v2224_v24, %v477_v21 }
  0xbd   : > { %v499_v8 = vadd.f32 %v2224_v24, %v478_v46  ;;  %v1300_v30 = vadd.f32 %v1294_v29, %v2178_v34  ;;  %v1301_v33 = vadd.f32 %v1295_v13, %v2180_v10  ;;  %v1302_v36 = vadd.f32 %v1296_v32, %v2183_v38  ;;  %v2586_v29 = vld [vmem:[#allocation11_spill] sm:$0xff] }
  0xbe   : > { %v1303_v16 = vadd.f32 %v1297_v4, %v2186_v12  ;;  %v531_v37 = vadd.f32 %v530_v63, %v496_v57  ;;  %v557_v47 = vadd.f32 %v556_v0, %v497_v58  ;;  %v528_v10 = vadd.f32 %v2208_v28, %v494_v60  ;;  %v2338_v28 = vpop.permute.xlu1 %570 }
  0xbf   : > { %v2305_v14 = vadd.f32 %v1300_v30, %v487_v20  ;;  %v2307_v51 = vadd.f32 %v1301_v33, %v487_v20  ;;  %v2310_v17 = vadd.f32 %v1302_v36, %v2224_v24  ;;  %v554_v38 = vadd.f32 %v2210_v26, %v495_v48  ;;  %v2331_v26 = vld [vmem:[%s2559_s7 + $0x8] sm:$0xff] }
  0xc0   : > { %v533_v6 = vpop.f32.mrf.mxu0  ;;  %v2313_v34 = vadd.f32 %v1303_v16, %v2224_v24  ;;  %v564_v63 = vmax.f32 %v531_v37, 0.0  ;;  %v565_v0 = vmax.f32 %v557_v47, 0.0  ;;  %v562_v20 = vmax.f32 %v528_v10, 0.0  ;;  %v2322_v24 = vld [vmem:[%s2559_s7] sm:$0xff]  ;;  %v2587_v16 = vld [vmem:[#allocation12_spill] sm:$0xff]  ;;  %v2588_v47 = vld [vmem:[#allocation13_spill] sm:$0xff] }
  0xc1   : > { %v559_v18 = vpop.f32.mrf.mxu1  ;;  %v534_v39 = vadd.f32 %v533_v6, %v498_v5  ;;  %v563_v1 = vmax.f32 %v554_v38, 0.0 }
  0xc2   : > { %v560_v9 = vadd.f32 %v559_v18, %v499_v8 }
  0xc3   : > { %v566_v12 = vmax.f32 %v534_v39, 0.0 }
  0xc4   : > { %v567_v35 = vmax.f32 %v560_v9, 0.0 }
  0xc5   : > { %1559 = vmatpush.msk.msra.mxu2 %vm585_vm1, %v566_v12 }
  0xc6   : > { %1562 = vmatpush.msk.msra.mxu3 %vm585_vm1, %v567_v35 }
  0xc7   : > { %606 = vmatpush.msra.mxu2 %v564_v63 }
  0xc8   : > { %629 = vmatpush.msra.mxu3 %v565_v0 }
  0xc9   : > { %607 = vmatpush.msra.mxu2 %v562_v20 }
  0xca   : > { %630 = vmatpush.msra.mxu3 %v563_v1  ;;  %1560 = vmatmul.msk.f32.vlgmr.msra.gmra.mxu2 %vm578_vm2, %v2322_v24 }
  0xcb   : > { %1563 = vmatmul.msk.f32.vlgmr.msra.gmra.mxu3 %vm578_vm2, %v2322_v24 }
  0xd2   : > { %1561 = vmatmul.msk.f32.gmra.mxu2 %vm578_vm2, %v2331_v26 }
  0xd3   : > { %1564 = vmatmul.msk.f32.gmra.mxu3 %vm578_vm2, %v2331_v26 }
 0x14d   : > { %v609_v2 = vpop.f32.mrf.mxu2 }
 0x14e   : > { %v632_v40 = vpop.f32.mrf.mxu3  ;;  %v610_v43 = vadd.f32 %v609_v2, %v2338_v28 }
 0x14f   : > { %v633_v21 = vadd.f32 %v632_v40, %v2338_v28 }
 0x150   : > { %v638_v46 = vmax.f32 %v610_v43, 0.0 }
 0x151   : > { %v639_v41 = vmax.f32 %v633_v21, 0.0 }
 0x152   : > { %642 = vst [vmem:[%s2342_s25] sm:$0xf] %v638_v46 }
 0x153   : > { %643 = vst [vmem:[%s2342_s25 + $0x8] sm:$0xf] %v639_v41 }
 0x155   : > { %v612_v27 = vpop.f32.mrf.mxu2 }
 0x156   : > { %v635_v31 = vpop.f32.mrf.mxu3  ;;  %v613_v45 = vadd.f32 %v612_v27, %v2346_v42 }
 0x157   : > { %v636_v59 = vadd.f32 %v635_v31, %v2346_v42 }
 0x158   : > { %v640_v60 = vmax.f32 %v613_v45, 0.0 }
 0x159   : > { %v641_v48 = vmax.f32 %v636_v59, 0.0 }
 0x15a   : > { %696 = vmatpush.msrb.mxu2 %v640_v60 }
 0x15b   : > { %722 = vmatpush.msrb.mxu3 %v641_v48 }
 0x15c   : > { %697 = vmatpush.msrb.mxu2 %v638_v46 }
 0x15d   : > { %723 = vmatpush.msrb.mxu3 %v639_v41  ;;  %1567 = vmatmul.msk.f32.vlgmr.msrb.gmra.mxu2 %vm500_vm0, %v1954_v7 }
 0x15e   : > { %1570 = vmatmul.msk.f32.vlgmr.msrb.gmra.mxu3 %vm500_vm0, %v1954_v7 }
 0x165   : > { %1568 = vmatmul.msk.f32.gmra.mxu2 %vm500_vm0, %v1972_v11 }
 0x166   : > { %1571 = vmatmul.msk.f32.gmra.mxu3 %vm500_vm0, %v1972_v11 }
 0x16d   : > { %1569 = vmatmul.msk.f32.gmra.mxu2 %vm500_vm0, %v2586_v29 }
 0x16e   : > { %1572 = vmatmul.msk.f32.gmra.mxu3 %vm500_vm0, %v2586_v29 }
 0x1e0   : > { %v699_v13 = vpop.f32.mrf.mxu2 }
 0x1e1   : > { %v725_v32 = vpop.f32.mrf.mxu3  ;;  %v700_v37 = vadd.f32 %v699_v13, %v2587_v16 }
 0x1e2   : > { %v726_v6 = vadd.f32 %v725_v32, %v2588_v47 }
 0x1e3   : > { %v734_v38 = vmax.f32 %v700_v37, 0.0 }
 0x1e8   : > { %v702_v4 = vpop.f32.mrf.mxu2 }
 0x1e9   : > { %v728_v57 = vpop.f32.mrf.mxu3  ;;  %v703_v8 = vadd.f32 %v702_v4, %v2231_v61  ;;  %v735_v61 = vmax.f32 %v726_v6, 0.0 }
 0x1ea   : > { %v729_v30 = vadd.f32 %v728_v57, %v2233_v25  ;;  %v2589_v57 = vld [vmem:[#allocation14_spill] sm:$0xff] }
 0x1eb   : > { %v736_v9 = vmax.f32 %v703_v8, 0.0 }
 0x1ec   : > { %v737_v10 = vmax.f32 %v729_v30, 0.0 }
 0x1f0   : > { %v705_v58 = vpop.f32.mrf.mxu2 }
 0x1f1   : > { %v731_v5 = vpop.f32.mrf.mxu3  ;;  %v706_v33 = vadd.f32 %v705_v58, %v2236_v62 }
 0x1f2   : > { %v732_v36 = vadd.f32 %v731_v5, %v2239_v53  ;;  %v2590_v5 = vld [vmem:[#allocation15_spill] sm:$0xff] }
 0x1f3   : > { %v738_v18 = vmax.f32 %v706_v33, 0.0 }
 0x1f4   : > { %v739_v39 = vmax.f32 %v732_v36, 0.0 }
 0x1f5   : > { %1573 = vmatpush.msk.msrb.mxu0 %vm585_vm1, %v738_v18 }
 0x1f6   : > { %1576 = vmatpush.msk.msrb.mxu1 %vm585_vm1, %v739_v39 }
 0x1f7   : > { %760 = vmatpush.msrb.mxu0 %v736_v9 }
 0x1f8   : > { %783 = vmatpush.msrb.mxu1 %v737_v10 }
 0x1f9   : > { %761 = vmatpush.msrb.mxu0 %v734_v38 }
 0x1fa   : > { %784 = vmatpush.msrb.mxu1 %v735_v61  ;;  %1574 = vmatmul.msk.f32.vlgmr.msrb.gmra.mxu0 %vm578_vm2, %v2322_v24 }
 0x1fb   : > { %1577 = vmatmul.msk.f32.vlgmr.msrb.gmra.mxu1 %vm578_vm2, %v2322_v24 }
 0x202   : > { %1575 = vmatmul.msk.f32.gmra.mxu0 %vm578_vm2, %v2331_v26 }
 0x203   : > { %1578 = vmatmul.msk.f32.gmra.mxu1 %vm578_vm2, %v2331_v26 }
 0x277   : > { %v763_v25 = vpop.f32.mrf.mxu0 }
 0x278   : > { %v786_v62 = vpop.f32.mrf.mxu1  ;;  %v764_v53 = vadd.f32 %v763_v25, %v2338_v28 }
 0x279   : > { %v787_v12 = vadd.f32 %v786_v62, %v2338_v28 }
 0x27a   : > { %v792_v35 = vmax.f32 %v764_v53, 0.0 }
 0x27b   : > { %v793_v63 = vmax.f32 %v787_v12, 0.0 }
 0x27c   : > { %v798_v0 = vrot.slane %v792_v35, 4 }
 0x27d   : > { %v799_v20 = vrot.slane %v793_v63, 4 }
 0x27e   : > { %802 = vst [vmem:[%s2342_s25] sm:$0xf0] %v798_v0 }
 0x27f   : > { %803 = vst [vmem:[%s2342_s25 + $0x8] sm:$0xf0] %v799_v20  ;;  %v766_v1 = vpop.f32.mrf.mxu0 }
 0x280   : > { %v789_v2 = vpop.f32.mrf.mxu1  ;;  %v767_v40 = vadd.f32 %v766_v1, %v2346_v42 }
 0x281   : > { %v790_v43 = vadd.f32 %v789_v2, %v2346_v42 }
 0x282   : > { %v794_v21 = vmax.f32 %v767_v40, 0.0 }
 0x283   : > { %v795_v46 = vmax.f32 %v790_v43, 0.0  ;;  %v2591_v43 = vld [vmem:[#allocation16_spill] sm:$0xff] }
 0x284   : > { %856 = vmatpush.msra.mxu0 %v794_v21 }
 0x285   : > { %882 = vmatpush.msra.mxu1 %v795_v46  ;;  %v2592_v46 = vld [vmem:[#allocation17_spill] sm:$0xff] }
 0x286   : > { %857 = vmatpush.msra.mxu0 %v792_v35 }
 0x287   : > { %883 = vmatpush.msra.mxu1 %v793_v63  ;;  %1581 = vmatmul.msk.f32.vlgmr.msra.gmra.mxu0 %vm500_vm0, %v1954_v7 }
 0x288   : > { %1584 = vmatmul.msk.f32.vlgmr.msra.gmra.mxu1 %vm500_vm0, %v1954_v7 }
 0x28f   : > { %1582 = vmatmul.msk.f32.gmra.mxu0 %vm500_vm0, %v1972_v11 }
 0x290   : > { %1585 = vmatmul.msk.f32.gmra.mxu1 %vm500_vm0, %v1972_v11 }
 0x297   : > { %1583 = vmatmul.msk.f32.gmra.mxu0 %vm500_vm0, %v2586_v29 }
 0x298   : > { %1586 = vmatmul.msk.f32.gmra.mxu1 %vm500_vm0, %v2586_v29 }
 0x304   : > { %v859_v41 = vpop.f32.mrf.mxu0 }
 0x305   : > { %v885_v27 = vpop.f32.mrf.mxu1  ;;  %v860_v58 = vadd.f32 %v859_v41, %v2589_v57 }
 0x306   : > { %v886_v8 = vadd.f32 %v885_v27, %v2590_v5 }
 0x307   : > { %v894_v37 = vmax.f32 %v860_v58, 0.0 }
 0x30c   : > { %v862_v31 = vpop.f32.mrf.mxu0 }
 0x30d   : > { %v888_v45 = vpop.f32.mrf.mxu1  ;;  %v863_v48 = vadd.f32 %v862_v31, %v2241_v44  ;;  %v895_v44 = vmax.f32 %v886_v8, 0.0 }
 0x30e   : > { %v889_v13 = vadd.f32 %v888_v45, %v2243_v55 }
 0x30f   : > { %v896_v36 = vmax.f32 %v863_v48, 0.0 }
 0x310   : > { %v897_v16 = vmax.f32 %v889_v13, 0.0 }
 0x314   : > { %v865_v59 = vpop.f32.mrf.mxu0 }
 0x315   : > { %v891_v60 = vpop.f32.mrf.mxu1  ;;  %v866_v32 = vadd.f32 %v865_v59, %v2246_v50 }
 0x316   : > { %v892_v4 = vadd.f32 %v891_v60, %v2249_v54 }
 0x317   : > { %v898_v30 = vmax.f32 %v866_v32, 0.0 }
 0x318   : > { %v899_v33 = vmax.f32 %v892_v4, 0.0 }
 0x319   : > { %1587 = vmatpush.msk.msra.mxu2 %vm585_vm1, %v898_v30 }
 0x31a   : > { %1590 = vmatpush.msk.msra.mxu3 %vm585_vm1, %v899_v33 }
 0x31b   : > { %920 = vmatpush.msra.mxu2 %v896_v36 }
 0x31c   : > { %943 = vmatpush.msra.mxu3 %v897_v16 }
 0x31d   : > { %921 = vmatpush.msra.mxu2 %v894_v37 }
 0x31e   : > { %944 = vmatpush.msra.mxu3 %v895_v44  ;;  %1588 = vmatmul.msk.f32.vlgmr.msra.gmra.mxu2 %vm578_vm2, %v2322_v24 }
 0x31f   : > { %1591 = vmatmul.msk.f32.vlgmr.msra.gmra.mxu3 %vm578_vm2, %v2322_v24 }
 0x326   : > { %1589 = vmatmul.msk.f32.gmra.mxu2 %vm578_vm2, %v2331_v26 }
 0x327   : > { %1592 = vmatmul.msk.f32.gmra.mxu3 %vm578_vm2, %v2331_v26 }
 0x3a1   : > { %v923_v55 = vpop.f32.mrf.mxu2 }
 0x3a2   : > { %v946_v50 = vpop.f32.mrf.mxu3  ;;  %v924_v54 = vadd.f32 %v923_v55, %v2338_v28 }
 0x3a3   : > { %v947_v47 = vadd.f32 %v946_v50, %v2338_v28 }
 0x3a4   : > { %v952_v6 = vmax.f32 %v924_v54, 0.0 }
 0x3a5   : > { %v953_v18 = vmax.f32 %v947_v47, 0.0 }
 0x3a6   : > { %956 = vst [vmem:[%s2342_s25 + $0x10] sm:$0xf] %v952_v6 }
 0x3a7   : > { %957 = vst [vmem:[%s2342_s25 + $0x18] sm:$0xf] %v953_v18 }
 0x3a9   : > { %v926_v39 = vpop.f32.mrf.mxu2 }
 0x3aa   : > { %v949_v9 = vpop.f32.mrf.mxu3  ;;  %v927_v10 = vadd.f32 %v926_v39, %v2346_v42 }
 0x3ab   : > { %v950_v38 = vadd.f32 %v949_v9, %v2346_v42  ;;  %v2593_v9 = vld [vmem:[#allocation18_spill] sm:$0xff] }
 0x3ac   : > { %v954_v61 = vmax.f32 %v927_v10, 0.0 }
 0x3ad   : > { %v955_v25 = vmax.f32 %v950_v38, 0.0  ;;  %v2594_v38 = vld [vmem:[#allocation19_spill] sm:$0xff] }
 0x3ae   : > { %1010 = vmatpush.msrb.mxu2 %v954_v61 }
 0x3af   : > { %1036 = vmatpush.msrb.mxu3 %v955_v25 }
 0x3b0   : > { %1011 = vmatpush.msrb.mxu2 %v952_v6 }
 0x3b1   : > { %1037 = vmatpush.msrb.mxu3 %v953_v18  ;;  %1595 = vmatmul.msk.f32.vlgmr.msrb.gmra.mxu2 %vm500_vm0, %v1954_v7 }
 0x3b2   : > { %1598 = vmatmul.msk.f32.vlgmr.msrb.gmra.mxu3 %vm500_vm0, %v1954_v7 }
 0x3b9   : > { %1596 = vmatmul.msk.f32.gmra.mxu2 %vm500_vm0, %v1972_v11 }
 0x3ba   : > { %1599 = vmatmul.msk.f32.gmra.mxu3 %vm500_vm0, %v1972_v11 }
 0x3c1   : > { %1597 = vmatmul.msk.f32.gmra.mxu2 %vm500_vm0, %v2586_v29 }
 0x3c2   : > { %1600 = vmatmul.msk.f32.gmra.mxu3 %vm500_vm0, %v2586_v29 }
 0x434   : > { %v1013_v62 = vpop.f32.mrf.mxu2 }
 0x435   : > { %v1039_v53 = vpop.f32.mrf.mxu3  ;;  %v1014_v21 = vadd.f32 %v1013_v62, %v2591_v43 }
 0x436   : > { %v1040_v41 = vadd.f32 %v1039_v53, %v2592_v46 }
 0x437   : > { %v1048_v60 = vmax.f32 %v1014_v21, 0.0 }
 0x43c   : > { %v1016_v12 = vpop.f32.mrf.mxu2 }
 0x43d   : > { %v1042_v35 = vpop.f32.mrf.mxu3  ;;  %v1017_v20 = vadd.f32 %v1016_v12, %v2251_v56  ;;  %v1049_v56 = vmax.f32 %v1040_v41, 0.0 }
 0x43e   : > { %v1043_v1 = vadd.f32 %v1042_v35, %v2253_v49 }
 0x43f   : > { %v1050_v45 = vmax.f32 %v1017_v20, 0.0 }
 0x440   : > { %v1051_v59 = vmax.f32 %v1043_v1, 0.0 }
 0x444   : > { %v1019_v63 = vpop.f32.mrf.mxu2 }
 0x445   : > { %v1045_v0 = vpop.f32.mrf.mxu3  ;;  %v1020_v2 = vadd.f32 %v1019_v63, %v2276_v52 }
 0x446   : > { %v1046_v40 = vadd.f32 %v1045_v0, %v2279_v15 }
 0x447   : > { %v1052_v27 = vmax.f32 %v1020_v2, 0.0 }
 0x448   : > { %v1053_v31 = vmax.f32 %v1046_v40, 0.0 }
 0x449   : > { %1601 = vmatpush.msk.msrb.mxu0 %vm585_vm1, %v1052_v27 }
 0x44a   : > { %1604 = vmatpush.msk.msrb.mxu1 %vm585_vm1, %v1053_v31 }
 0x44b   : > { %1074 = vmatpush.msrb.mxu0 %v1050_v45 }
 0x44c   : > { %1097 = vmatpush.msrb.mxu1 %v1051_v59 }
 0x44d   : > { %1075 = vmatpush.msrb.mxu0 %v1048_v60 }
 0x44e   : > { %1098 = vmatpush.msrb.mxu1 %v1049_v56  ;;  %1602 = vmatmul.msk.f32.vlgmr.msrb.gmra.mxu0 %vm578_vm2, %v2322_v24 }
 0x44f   : > { %1605 = vmatmul.msk.f32.vlgmr.msrb.gmra.mxu1 %vm578_vm2, %v2322_v24 }
 0x456   : > { %1603 = vmatmul.msk.f32.gmra.mxu0 %vm578_vm2, %v2331_v26 }
 0x457   : > { %1606 = vmatmul.msk.f32.gmra.mxu1 %vm578_vm2, %v2331_v26 }
 0x4cb   : > { %v1077_v49 = vpop.f32.mrf.mxu0 }
 0x4cc   : > { %v1100_v52 = vpop.f32.mrf.mxu1  ;;  %v1078_v15 = vadd.f32 %v1077_v49, %v2338_v28  ;;  %v2595_v49 = vld [vmem:[#allocation20_spill] sm:$0xff] }
 0x4cd   : > { %v1101_v48 = vadd.f32 %v1100_v52, %v2338_v28 }
 0x4ce   : > { %v1106_v13 = vmax.f32 %v1078_v15, 0.0  ;;  %v2596_v15 = vld [vmem:[#allocation21_spill] sm:$0xff] }
 0x4cf   : > { %v1107_v32 = vmax.f32 %v1101_v48, 0.0 }
 0x4d0   : > { %v1112_v4 = vrot.slane %v1106_v13, 4 }
 0x4d1   : > { %v1113_v57 = vrot.slane %v1107_v32, 4 }
 0x4d2   : > { %1116 = vst [vmem:[%s2342_s25 + $0x10] sm:$0xf0] %v1112_v4 }
 0x4d3   : > { %1117 = vst [vmem:[%s2342_s25 + $0x18] sm:$0xf0] %v1113_v57  ;;  %v1080_v58 = vpop.f32.mrf.mxu0 }
 0x4d4   : > { %v1103_v5 = vpop.f32.mrf.mxu1  ;;  %v1081_v8 = vadd.f32 %v1080_v58, %v2346_v42 }
 0x4d5   : > { %v1104_v30 = vadd.f32 %v1103_v5, %v2346_v42 }
 0x4d6   : > { %v1108_v33 = vmax.f32 %v1081_v8, 0.0 }
 0x4d7   : > { %v1109_v36 = vmax.f32 %v1104_v30, 0.0 }
 0x4d8   : > { %1170 = vmatpush.msra.mxu0 %v1108_v33 }
 0x4d9   : > { %1196 = vmatpush.msra.mxu1 %v1109_v36 }
 0x4da   : > { %1171 = vmatpush.msra.mxu0 %v1106_v13 }
 0x4db   : > { %1197 = vmatpush.msra.mxu1 %v1107_v32  ;;  %1609 = vmatmul.msk.f32.vlgmr.msra.gmra.mxu0 %vm500_vm0, %v1954_v7 }
 0x4dc   : > { %1612 = vmatmul.msk.f32.vlgmr.msra.gmra.mxu1 %vm500_vm0, %v1954_v7 }
 0x4e3   : > { %1610 = vmatmul.msk.f32.gmra.mxu0 %vm500_vm0, %v1972_v11 }
 0x4e4   : > { %1613 = vmatmul.msk.f32.gmra.mxu1 %vm500_vm0, %v1972_v11 }
 0x4eb   : > { %1611 = vmatmul.msk.f32.gmra.mxu0 %vm500_vm0, %v2586_v29 }
 0x4ec   : > { %1614 = vmatmul.msk.f32.gmra.mxu1 %vm500_vm0, %v2586_v29 }
 0x558   : > { %v1173_v16 = vpop.f32.mrf.mxu0 }
 0x559   : > { %v1199_v37 = vpop.f32.mrf.mxu1  ;;  %v1174_v10 = vadd.f32 %v1173_v16, %v2593_v9 }
 0x55a   : > { %v1200_v61 = vadd.f32 %v1199_v37, %v2594_v38 }
 0x55b   : > { %v1208_v35 = vmax.f32 %v1174_v10, 0.0 }
 0x560   : > { %v1176_v44 = vpop.f32.mrf.mxu0 }
 0x561   : > { %v1202_v55 = vpop.f32.mrf.mxu1  ;;  %v1177_v47 = vadd.f32 %v1176_v44, %v2281_v19  ;;  %v1209_v19 = vmax.f32 %v1200_v61, 0.0 }
 0x562   : > { %v1203_v6 = vadd.f32 %v1202_v55, %v2283_v22 }
 0x563   : > { %v1210_v53 = vmax.f32 %v1177_v47, 0.0 }
 0x564   : > { %v1211_v12 = vmax.f32 %v1203_v6, 0.0 }
 0x568   : > { %v1179_v50 = vpop.f32.mrf.mxu0 }
 0x569   : > { %v1205_v54 = vpop.f32.mrf.mxu1  ;;  %v1180_v18 = vadd.f32 %v1179_v50, %v2286_v23 }
 0x56a   : > { %v1206_v39 = vadd.f32 %v1205_v54, %v2289_v3 }
 0x56b   : > { %v1212_v25 = vmax.f32 %v1180_v18, 0.0 }
 0x56c   : > { %v1213_v62 = vmax.f32 %v1206_v39, 0.0 }
 0x56d   : > { %1615 = vmatpush.msk.msra.mxu2 %vm585_vm1, %v1212_v25 }
 0x56e   : > { %1618 = vmatpush.msk.msra.mxu3 %vm585_vm1, %v1213_v62 }
 0x56f   : > { %1234 = vmatpush.msra.mxu2 %v1210_v53 }
 0x570   : > { %1257 = vmatpush.msra.mxu3 %v1211_v12 }
 0x571   : > { %1235 = vmatpush.msra.mxu2 %v1208_v35 }
 0x572   : > { %1258 = vmatpush.msra.mxu3 %v1209_v19  ;;  %1616 = vmatmul.msk.f32.vlgmr.msra.gmra.mxu2 %vm578_vm2, %v2322_v24 }
 0x573   : > { %1619 = vmatmul.msk.f32.vlgmr.msra.gmra.mxu3 %vm578_vm2, %v2322_v24 }
 0x57a   : > { %1617 = vmatmul.msk.f32.gmra.mxu2 %vm578_vm2, %v2331_v26 }
 0x57b   : > { %1620 = vmatmul.msk.f32.gmra.mxu3 %vm578_vm2, %v2331_v26 }
 0x5f5   : > { %v1237_v22 = vpop.f32.mrf.mxu2 }
 0x5f6   : > { %v1260_v23 = vpop.f32.mrf.mxu3  ;;  %v1238_v3 = vadd.f32 %v1237_v22, %v2338_v28 }
 0x5f7   : > { %v1261_v63 = vadd.f32 %v1260_v23, %v2338_v28 }
 0x5f8   : > { %v1266_v0 = vmax.f32 %v1238_v3, 0.0 }
 0x5f9   : > { %v1267_v20 = vmax.f32 %v1261_v63, 0.0 }
 0x5fa   : > { %1270 = vst [vmem:[%s2342_s25 + $0x20] sm:$0xf] %v1266_v0 }
 0x5fb   : > { %1271 = vst [vmem:[%s2342_s25 + $0x28] sm:$0xf] %v1267_v20 }
 0x5fd   : > { %v1240_v1 = vpop.f32.mrf.mxu2 }
 0x5fe   : > { %v1263_v2 = vpop.f32.mrf.mxu3  ;;  %v1241_v40 = vadd.f32 %v1240_v1, %v2346_v42 }
 0x5ff   : > { %v1264_v43 = vadd.f32 %v1263_v2, %v2346_v42 }
 0x600   : > { %v1268_v21 = vmax.f32 %v1241_v40, 0.0 }
 0x601   : > { %v1269_v46 = vmax.f32 %v1264_v43, 0.0 }
 0x602   : > { %1324 = vmatpush.msrb.mxu2 %v1268_v21 }
 0x603   : > { %1350 = vmatpush.msrb.mxu3 %v1269_v46 }
 0x604   : > { %1325 = vmatpush.msrb.mxu2 %v1266_v0 }
 0x605   : > { %1351 = vmatpush.msrb.mxu3 %v1267_v20  ;;  %1623 = vmatmul.msk.f32.vlgmr.msrb.gmra.mxu2 %vm500_vm0, %v1954_v7 }
 0x606   : > { %1626 = vmatmul.msk.f32.vlgmr.msrb.gmra.mxu3 %vm500_vm0, %v1954_v7 }
 0x60d   : > { %1624 = vmatmul.msk.f32.gmra.mxu2 %vm500_vm0, %v1972_v11 }
 0x60e   : > { %1627 = vmatmul.msk.f32.gmra.mxu3 %vm500_vm0, %v1972_v11 }
 0x615   : > { %1625 = vmatmul.msk.f32.gmra.mxu2 %vm500_vm0, %v2586_v29 }
 0x616   : > { %1628 = vmatmul.msk.f32.gmra.mxu3 %vm500_vm0, %v2586_v29 }
 0x688   : > { %v1327_v42 = vpop.f32.mrf.mxu2 }
 0x689   : > { %v1353_v41 = vpop.f32.mrf.mxu3  ;;  %v1328_v52 = vadd.f32 %v1327_v42, %v2595_v49 }
 0x68a   : > { %v1354_v48 = vadd.f32 %v1353_v41, %v2596_v15 }
 0x690   : > { %v1330_v27 = vpop.f32.mrf.mxu2 }
 0x691   : > { %v1356_v31 = vpop.f32.mrf.mxu3  ;;  %v1331_v7 = vadd.f32 %v1330_v27, %v2305_v14  ;;  %v1362_v14 = vmax.f32 %v1328_v52, 0.0 }
 0x692   : > { %v1357_v60 = vadd.f32 %v1356_v31, %v2307_v51  ;;  %v1363_v51 = vmax.f32 %v1354_v48, 0.0 }
 0x693   : > { %v1364_v32 = vmax.f32 %v1331_v7, 0.0 }
 0x694   : > { %v1365_v4 = vmax.f32 %v1357_v60, 0.0 }
 0x698   : > { %v1333_v45 = vpop.f32.mrf.mxu2 }
 0x699   : > { %v1359_v59 = vpop.f32.mrf.mxu3  ;;  %v1334_v56 = vadd.f32 %v1333_v45, %v2310_v17 }
 0x69a   : > { %v1360_v11 = vadd.f32 %v1359_v59, %v2313_v34 }
 0x69b   : > { %v1366_v13 = vmax.f32 %v1334_v56, 0.0 }
 0x69c   : > { %v1367_v29 = vmax.f32 %v1360_v11, 0.0 }
 0x69d   : > { %1629 = vmatpush.msk.msrb.mxu0 %vm585_vm1, %v1366_v13 }
 0x69e   : > { %1632 = vmatpush.msk.msrb.mxu1 %vm585_vm1, %v1367_v29 }
 0x69f   : > { %1388 = vmatpush.msrb.mxu0 %v1364_v32 }
 0x6a0   : > { %1410 = vmatpush.msrb.mxu1 %v1365_v4 }
 0x6a1   : > { %1389 = vmatpush.msrb.mxu0 %v1362_v14 }
 0x6a2   : > { %1411 = vmatpush.msrb.mxu1 %v1363_v51  ;;  %1630 = vmatmul.msk.f32.vlgmr.msrb.gmra.mxu0 %vm578_vm2, %v2322_v24 }
 0x6a3   : > { %1633 = vmatmul.msk.f32.vlgmr.msrb.gmra.mxu1 %vm578_vm2, %v2322_v24 }
 0x6aa   : > { %1631 = vmatmul.msk.f32.gmra.mxu0 %vm578_vm2, %v2331_v26 }
 0x6ab   : > { %1634 = vmatmul.msk.f32.gmra.mxu1 %vm578_vm2, %v2331_v26 }
 0x71f   : > { %v1391_v17 = vpop.f32.mrf.mxu0 }
 0x720   : > { %v1413_v34 = vpop.f32.mrf.mxu1  ;;  %v1392_v57 = vadd.f32 %v1391_v17, %v2338_v28 }
 0x721   : > { %v1414_v24 = vadd.f32 %v1413_v34, %v2338_v28 }
 0x722   : > { %v1418_v58 = vmax.f32 %v1392_v57, 0.0 }
 0x723   : > { %v1419_v5 = vmax.f32 %v1414_v24, 0.0 }
 0x724   : > { %v1422_v26 = vrot.slane %v1418_v58, 4 }
 0x725   : > { %v1423_v8 = vrot.slane %v1419_v5, 4 }
 0x726   : > { %1426 = vst [vmem:[%s2342_s25 + $0x20] sm:$0xf0] %v1422_v26 }
 0x727   : > { %1427 = vst [vmem:[%s2342_s25 + $0x28] sm:$0xf0] %v1423_v8  ;;  %v1394_v30 = vpop.f32.mrf.mxu0 }
 0x728   : > { %v1416_v33 = vpop.f32.mrf.mxu1 }
 0x729   : > { %1755 = shalt.err (!%p1752_p8)
}
 0x72a   : > { %s1800_s24 = smov 256   ;;  %s1801_s25 = smov 512  }
 0x72b   : > { %s1802_s18 = smov 16  }
 0x72c   : > { %1644 = dma.vmem_to_hbm [thread:$0]  (%p1903_p11), %s1442_s20, 768, %s1444_s26, %s1429_s13, %s1800_s24, %s1801_s25, %s1802_s18  }
 0x72d PF: > { %s1458_s29 = sand.u32 1, %s1782_s30   ;;  %p1651_p10 = pnand %p1543_p9, %p1907_p12 }
 0x72e   : > { %s1459_s14 = scalar_lea.sflag [#allocation4], %s1458_s29 }
 0x72f   : > { %p1652_p1 = pneg %p1651_p10 }
 0x731   : > { %1777 = dma.done.wait (%p1652_p1), %s1459_s14, 768  }
 0x732   : > { %1779 = vsyncadd (%p1652_p1), %s1459_s14, 4294966528  ;;  %s2597_s12 = sld [smem:[#allocation9_spill]]  ;;  %s2600_s30 = smov %s1786_s10 }
 0x733   : > { %s2598_s17 = sld [smem:[#allocation8_spill]] }
 0x734   : > { %s2599_s11 = sld [smem:[#allocation10_spill]] }
 0x738   : > { %p22_p2 = scmp.ge.s32.totalorder %s2597_s12, 4  }
 0x739   : > { %s2601_s10 = smov %s2598_s17 }
 0x73a   :  { %24 = sbr.rel (!%p22_p2) target bundleno = 5 (0x5), region = 117 }
 0x73f   :  { %1465 = vsyncpa [#allocation3], 1 }
 0x740   :  { %1467 = vsyncpa [#allocation3 + $0x1], 1 }
 0x741   :  { %1468 = vsyncpa [#allocation4], 1 }
 0x742   :  { %1470 = vsyncpa [#allocation4 + $0x1], 1 }

</bundles_post_ra>
